<compile_context>
chip_gen: v6e
topology: v6e:2x2x1
jax: 0.10.0
libtpu: 0.0.40
codegen_flags: <defaults>
</compile_context>

<pallas_src>
import numpy as np
import jax
import jax.numpy as jnp
from jax.experimental import pallas as pl
from jax.experimental.pallas import tpu as pltpu

EPS = 1e-5
# f32 by default (store-bound at this size; keeps 1e-3 agreement with the f32
# reference). Set to jnp.bfloat16 on v6e/v7x at larger, MXU-bound shapes.
MATMUL_DTYPE = jnp.float32


# ---------------------------------------------------------------------------
# Fused kernel (built as a closure over the static shape parameters)
# ---------------------------------------------------------------------------
def _make_kernel(N, H, W, Cin, C, Ct):
    R = N * H                      # rows of the lane-dense layout
    WC = W * C                     # lanes of the mid activations
    inv_cnt = 1.0 / (N * H * W)    # BN reduces over N*H*W pixels per channel

    def kernel(x_ref, b1_ref, g1_ref, be1_ref,
               b2_ref, g2_ref, be2_ref,
               p_ref, wtf_ref, btf_ref,
               out_ref, xp1_ref, xp2_ref):
        """Shapes:
          x_ref  : (N, H, W*Cin)        lane-dense input rows
          b1_ref : (3, W*Cin, W*C)      conv1 banded weights (one per ky)
          b2_ref : (3, W*C,   W*C)      conv2 banded weights
          g*/be* : (1, W*C)             BN gamma/beta pre-tiled over W
          p_ref  : (W*C, W*C)           P[a,b] = (a%C == b%C): sums over W and
                                        re-tiles per-channel stats to lanes
          wtf_ref: (W*C, 4*W*Ct)        convT weights, columns (di, j, dj, co)
          btf_ref: (1, 4*W*Ct)          convT bias tiled to match
          out_ref: (N*H, 4*W*Ct)        row-major identical to NHWC (N,2H,2W,Ct)
          xp*_ref: (N, H+2, W*C{in,})   H-only padded activation scratch
        """
        P = p_ref[...]
        ones8 = jnp.ones((8, R), jnp.float32)   # MXU-friendly reduction operand

        def mxu(a, b):
            return jnp.dot(a.astype(MATMUL_DTYPE), b.astype(MATMUL_DTYPE),
                           preferred_element_type=jnp.float32)

        def bn_relu(acc, gamma, beta):
            # Training-mode BatchNorm (batch stats, biased variance) + ReLU,
            # fully lane-dense. Column sums run on the MXU (ones @ acc); the P
            # matmul folds the sum over W and broadcasts the per-channel stat
            # back across the (j, c) lanes in one shot.  Two-pass centered
            # variance is kept on purpose (single-pass E[x^2]-mean^2 would save
            # one serialized ones-matmul but risks cancellation).
            colsum = jnp.dot(ones8, acc, preferred_element_type=jnp.float32)[0:1]
            mean = jnp.dot(colsum, P, preferred_element_type=jnp.float32) * inv_cnt
            cent = acc - mean
            colcss = jnp.dot(ones8, cent * cent,
                             preferred_element_type=jnp.float32)[0:1]
            var = jnp.dot(colcss, P, preferred_element_type=jnp.float32) * inv_cnt
            return jnp.maximum(cent * jax.lax.rsqrt(var + EPS) * gamma + beta, 0.0)

        def conv3x3(xp_ref, band_ref):
            # 3 H-shifted row-window matmuls against banded weights. The W halo
            # (padding=1) lives inside the bands, so there is no im2col scratch,
            # no masked column stores and no strided W slices.
            wcx = xp_ref.shape[-1]
            acc = mxu(xp_ref[:, 0:H, :].reshape(R, wcx), band_ref[0])
            acc += mxu(xp_ref[:, 1:H + 1, :].reshape(R, wcx), band_ref[1])
            acc += mxu(xp_ref[:, 2:H + 2, :].reshape(R, wcx), band_ref[2])
            return acc

        # ---- stage 1: conv3x3 (pad 1) + BN + ReLU --------------------------
        # Conv bias omitted: cancelled exactly by train-mode BN mean subtraction.
        zrow1 = jnp.zeros((N, 1, W * Cin), jnp.float32)
        xp1_ref[:, 0:1, :] = zrow1                      # only the halo is zeroed
        xp1_ref[:, H + 1:H + 2, :] = zrow1
        xp1_ref[:, 1:H + 1, :] = x_ref[...]             # single dense interior store
        z1 = bn_relu(conv3x3(xp1_ref, b1_ref), g1_ref[...], be1_ref[...])  # (R, WC)

        # ---- stage 2: conv3x3 (pad 1) + BN + ReLU --------------------------
        zrow2 = jnp.zeros((N, 1, WC), jnp.float32)
        xp2_ref[:, 0:1, :] = zrow2
        xp2_ref[:, H + 1:H + 2, :] = zrow2
        xp2_ref[:, 1:H + 1, :] = z1.reshape(N, H, WC)
        z2 = bn_relu(conv3x3(xp2_ref, b2_ref), g2_ref[...], be2_ref[...])  # (R, WC)

        # ---- ConvTranspose2d k=2 s=2: one matmul, one dense 4*W*Ct-lane store
        # Column order (di, j, dj, co) makes this buffer row-major identical to
        # NHWC (N, 2H, 2W, Ct) -> the spatial interleave is a free reshape.
        out_ref[...] = mxu(z2, wtf_ref[...]) + btf_ref[...]

    return kernel


# ---------------------------------------------------------------------------
# Wrapper
# ---------------------------------------------------------------------------
def bottleneck_forward(x_nchw, params):
    N, Cin, H, W = x_nchw.shape
    WC = params["band2"].shape[-1]
    C = WC // W
    Ct = params["btf"].shape[-1] // (4 * W)

    # NCHW -> lane-dense rows (N, H, W*Cin): interface glue only.
    x_rows = jnp.transpose(x_nchw, (0, 2, 3, 1)).reshape(N, H, W * Cin)

    kernel = _make_kernel(N, H, W, Cin, C, Ct)

    # TODO(synk): for production sizes, add a row-block grid (two-phase BN stats
    # via CMEM/SMEM + core_barrier) so HBM DMA pipelines against compute and
    # both v7x TensorCores are used; at this toy size grid steps are pure overhead.
    out2d = pl.pallas_call(
        kernel,
        out_shape=jax.ShapeDtypeStruct((N * H, 4 * W * Ct), jnp.float32),
        in_specs=[pl.BlockSpec(memory_space=pltpu.MemorySpace.VMEM)] * 10,
        out_specs=pl.BlockSpec(memory_space=pltpu.MemorySpace.VMEM),
        scratch_shapes=[
            pltpu.VMEM((N, H + 2, W * Cin), jnp.float32),   # H-padded input rows
            pltpu.VMEM((N, H + 2, W * C), jnp.float32),     # H-padded stage-1 act
        ],
        compiler_params=pltpu.CompilerParams(vmem_limit_bytes=32 * 1024 * 1024),
    )(x_rows,
      params["band1"], params["g1"], params["be1"],
      params["band2"], params["g2"], params["be2"],
      params["P"], params["wtf"], params["btf"])

    # (N*H, 4*W*Ct) is row-major identical to NHWC (N, 2H, 2W, Ct).
    out = out2d.reshape(N, 2 * H, 2 * W, Ct)
    return jnp.transpose(out, (0, 3, 1, 2))            # NHWC -> NCHW interface


# ---------------------------------------------------------------------------
# One-time weight preparation (host side)
# ---------------------------------------------------------------------------
def _conv_band(w, Wdim):
    """PyTorch Conv2d weight (Cout, Cin, 3, 3) -> banded matmul operands
    (3, Wdim*Cin, Wdim*Cout) with band[ky][(j+kx-1)*Cin+ci, j*Cout+co] =
    w[co, ci, ky, kx]; out-of-range j+kx-1 omitted == zero padding along W."""
    w_np = np.asarray(w, np.float32)
    Cout, Cin = w_np.shape[:2]
    band = np.zeros((3, Wdim * Cin, Wdim * Cout), np.float32)
    for ky in range(3):
        for kx in range(3):
            blk = w_np[:, :, ky, kx].T          # (Cin, Cout)
            for j in range(Wdim):
                js = j + kx - 1
                if 0 <= js < Wdim:
                    band[ky, js * Cin:(js + 1) * Cin, j * Cout:(j + 1) * Cout] = blk
    return jnp.asarray(band)


def _convT_full(wt, Wdim):
    """PyTorch ConvTranspose2d weight (C, Ct, 2, 2) -> (Wdim*C, 4*Wdim*Ct)
    block matrix; column order (di, j, dj, co) so the kernel's single output
    store is row-major identical to NHWC (N, 2H, 2W, Ct)."""
    wt_np = np.asarray(wt, np.float32)
    C, Ct = wt_np.shape[:2]
    m = np.zeros((Wdim * C, 4 * Wdim * Ct), np.float32)
    for di in range(2):
        for dj in range(2):
            blk = wt_np[:, :, di, dj]           # (C, Ct)
            for j in range(Wdim):
                col = di * (2 * Wdim * Ct) + j * (2 * Ct) + dj * Ct
                m[j * C:(j + 1) * C, col:col + Ct] = blk
    return jnp.asarray(m)


def make_params(w1, w2, wt, bt, Wdim):
    """Pre-reshape PyTorch-layout weights into lane-dense matmul operands.
    Conv biases are intentionally absent: training-mode BN cancels them exactly
    (keep them / fold into the BN shift if this block is ever run in eval mode)."""
    C = w1.shape[0]
    ch = np.arange(Wdim * C) % C
    gamma = np.ones(C, np.float32)              # BatchNorm affine defaults
    beta = np.zeros(C, np.float32)
    tile_c = lambda v: jnp.asarray(np.tile(v, Wdim)[None, :])       # (1, W*C)
    return {
        "band1": _conv_band(w1, Wdim),
        "band2": _conv_band(w2, Wdim),
        "g1": tile_c(gamma), "be1": tile_c(beta),
        "g2": tile_c(gamma), "be2": tile_c(beta),
        "P": jnp.asarray((ch[:, None] == ch[None, :]).astype(np.float32)),
        "wtf": _convT_full(wt, Wdim),
        "btf": jnp.asarray(np.tile(np.asarray(bt, np.float32), 4 * Wdim)[None, :]),
    }


# ---------------------------------------------------------------------------
# Pure-JAX reference (mirrors PyTorch semantics, incl. the conv biases that the
# kernel drops because train-mode BN cancels them exactly).
# ---------------------------------------------------------------------------
def reference_forward(x_nchw, w1, b1, w2, b2, wt, bt):
    dn = ("NCHW", "OIHW", "NCHW")

    def bn_relu(z):
        mean = jnp.mean(z, axis=(0, 2, 3), keepdims=True)
        var = jnp.mean((z - mean) ** 2, axis=(0, 2, 3), keepdims=True)
        return jnp.maximum((z - mean) * jax.lax.rsqrt(var + EPS), 0.0)

    z = jax.lax.conv_general_dilated(x_nchw, w1, (1, 1), ((1, 1), (1, 1)),
                                     dimension_numbers=dn)
    z = bn_relu(z + b1[None, :, None, None])
    z = jax.lax.conv_general_dilated(z, w2, (1, 1), ((1, 1), (1, 1)),
                                     dimension_numbers=dn)
    z = bn_relu(z + b2[None, :, None, None])

    N, C, H, W = z.shape
    Co = wt.shape[1]
    out = jnp.zeros((N, Co, 2 * H, 2 * W), jnp.float32)
    for di in range(2):
        for dj in range(2):
            tap = jnp.einsum("ncij,co->noij", z, wt[:, :, di, dj])
            out = out.at[:, :, di::2, dj::2].set(tap)
    return out + bt[None, :, None, None]


if __name__ == "__main__":
    key = jax.random.PRNGKey(0)
    N, Cin, H, W = 2, 4, 16, 16
    C = 8  # out_channels of the bottleneck

    ks = jax.random.split(key, 8)
    x = jax.random.normal(ks[0], (N, Cin, H, W), jnp.float32)

    # PyTorch-layout parameters (deterministic synthetic init).
    w1 = jax.random.normal(ks[1], (C, Cin, 3, 3), jnp.float32) * 0.1
    b1 = jax.random.normal(ks[2], (C,), jnp.float32) * 0.05
    w2 = jax.random.normal(ks[3], (C, C, 3, 3), jnp.float32) * 0.1
    b2 = jax.random.normal(ks[4], (C,), jnp.float32) * 0.05
    wt = jax.random.normal(ks[5], (C, Cin, 2, 2), jnp.float32) * 0.1  # (in, out, kh, kw)
    bt = jax.random.normal(ks[6], (Cin,), jnp.float32) * 0.05

    params = make_params(w1, w2, wt, bt, W)

    out = jax.jit(bottleneck_forward)(x, params)
    out = jax.block_until_ready(out)
    assert out.shape == (N, Cin, 2 * H, 2 * W), out.shape

    ref = reference_forward(x, w1, b1, w2, b2, wt, bt)
    max_err = float(jnp.max(jnp.abs(out - ref)))
    assert jnp.allclose(out, ref, rtol=1e-3, atol=1e-3), max_err

    print("KERNEL_OK")
</pallas_src>

<mosaic_0001>
module attributes {stable_mosaic.version = 11 : i64} {
  func.func @kernel(%arg0: memref<2x16x64xf32, #tpu.memory_space<vmem>>, %arg1: memref<3x64x128xf32, #tpu.memory_space<vmem>>, %arg2: memref<1x128xf32, #tpu.memory_space<vmem>>, %arg3: memref<1x128xf32, #tpu.memory_space<vmem>>, %arg4: memref<3x128x128xf32, #tpu.memory_space<vmem>>, %arg5: memref<1x128xf32, #tpu.memory_space<vmem>>, %arg6: memref<1x128xf32, #tpu.memory_space<vmem>>, %arg7: memref<128x128xf32, #tpu.memory_space<vmem>>, %arg8: memref<128x256xf32, #tpu.memory_space<vmem>>, %arg9: memref<1x256xf32, #tpu.memory_space<vmem>>, %arg10: memref<32x256xf32, #tpu.memory_space<vmem>>, %arg11: memref<2x18x64xf32, #tpu.memory_space<vmem>>, %arg12: memref<2x18x128xf32, #tpu.memory_space<vmem>>) attributes {dimension_semantics = [], scalar_prefetch = 0 : i64, scratch_operands = 2 : i64, tpu.core_type = #tpu.core_type<tc>} {
    %c0 = arith.constant 0 : index
    %c0_0 = arith.constant 0 : index
    %0 = vector.load %arg7[%c0, %c0_0] : memref<128x128xf32, #tpu.memory_space<vmem>>, vector<128x128xf32>
    %cst = arith.constant 1.000000e+00 : f32
    %1 = vector.broadcast %cst : f32 to vector<8x32xf32>
    %cst_1 = arith.constant 0.000000e+00 : f32
    %2 = vector.broadcast %cst_1 : f32 to vector<2x1x64xf32>
    %c0_2 = arith.constant 0 : index
    %c0_3 = arith.constant 0 : index
    %c0_4 = arith.constant 0 : index
    %3 = vector.load %arg11[%c0_2, %c0_3, %c0_4] : memref<2x18x64xf32, #tpu.memory_space<vmem>>, vector<2x1x64xf32>
    tpu.vector_store %arg11[%c0_2, %c0_3, %c0_4], %2 {strides = array<i32>} : memref<2x18x64xf32, #tpu.memory_space<vmem>>, vector<2x1x64xf32>,
    %c0_5 = arith.constant 0 : index
    %c17 = arith.constant 17 : index
    %c0_6 = arith.constant 0 : index
    %4 = vector.load %arg11[%c0_5, %c17, %c0_6] : memref<2x18x64xf32, #tpu.memory_space<vmem>>, vector<2x1x64xf32>
    tpu.vector_store %arg11[%c0_5, %c17, %c0_6], %2 {strides = array<i32>} : memref<2x18x64xf32, #tpu.memory_space<vmem>>, vector<2x1x64xf32>,
    %c0_7 = arith.constant 0 : index
    %c0_8 = arith.constant 0 : index
    %c0_9 = arith.constant 0 : index
    %5 = vector.load %arg0[%c0_7, %c0_8, %c0_9] : memref<2x16x64xf32, #tpu.memory_space<vmem>>, vector<2x16x64xf32>
    %c0_10 = arith.constant 0 : index
    %c1 = arith.constant 1 : index
    %c0_11 = arith.constant 0 : index
    %6 = vector.load %arg11[%c0_10, %c1, %c0_11] : memref<2x18x64xf32, #tpu.memory_space<vmem>>, vector<2x16x64xf32>
    tpu.vector_store %arg11[%c0_10, %c1, %c0_11], %5 {strides = array<i32>} : memref<2x18x64xf32, #tpu.memory_space<vmem>>, vector<2x16x64xf32>,
    %c0_12 = arith.constant 0 : index
    %c0_13 = arith.constant 0 : index
    %c0_14 = arith.constant 0 : index
    %7 = vector.load %arg11[%c0_12, %c0_13, %c0_14] : memref<2x18x64xf32, #tpu.memory_space<vmem>>, vector<2x16x64xf32>
    %8 = vector.shape_cast %7 : vector<2x16x64xf32> to vector<32x64xf32>
    %c0_15 = arith.constant 0 : index
    %c0_16 = arith.constant 0 : index
    %c0_17 = arith.constant 0 : index
    %9 = vector.load %arg1[%c0_15, %c0_16, %c0_17] : memref<3x64x128xf32, #tpu.memory_space<vmem>>, vector<1x64x128xf32>
    %10 = vector.shape_cast %9 : vector<1x64x128xf32> to vector<64x128xf32>
    %cst_18 = arith.constant dense<0.000000e+00> : vector<32x128xf32>
    %11 = tpu.matmul %8, %10, %cst_18 {dimension_numbers = #tpu.dot_dimension_numbers<[1], [0], [0], [1], [0, 0, 1, 1], [], []>} : vector<32x64xf32>, vector<64x128xf32>, vector<32x128xf32> -> vector<32x128xf32>
    %c0_19 = arith.constant 0 : index
    %c1_20 = arith.constant 1 : index
    %c0_21 = arith.constant 0 : index
    %12 = vector.load %arg11[%c0_19, %c1_20, %c0_21] : memref<2x18x64xf32, #tpu.memory_space<vmem>>, vector<2x16x64xf32>
    %13 = vector.shape_cast %12 : vector<2x16x64xf32> to vector<32x64xf32>
    %c1_22 = arith.constant 1 : index
    %c0_23 = arith.constant 0 : index
    %c0_24 = arith.constant 0 : index
    %14 = vector.load %arg1[%c1_22, %c0_23, %c0_24] : memref<3x64x128xf32, #tpu.memory_space<vmem>>, vector<1x64x128xf32>
    %15 = vector.shape_cast %14 : vector<1x64x128xf32> to vector<64x128xf32>
    %cst_25 = arith.constant dense<0.000000e+00> : vector<32x128xf32>
    %16 = tpu.matmul %13, %15, %cst_25 {dimension_numbers = #tpu.dot_dimension_numbers<[1], [0], [0], [1], [0, 0, 1, 1], [], []>} : vector<32x64xf32>, vector<64x128xf32>, vector<32x128xf32> -> vector<32x128xf32>
    %17 = arith.addf %11, %16 : vector<32x128xf32>
    %c0_26 = arith.constant 0 : index
    %c2 = arith.constant 2 : index
    %c0_27 = arith.constant 0 : index
    %18 = vector.load %arg11[%c0_26, %c2, %c0_27] : memref<2x18x64xf32, #tpu.memory_space<vmem>>, vector<2x16x64xf32>
    %19 = vector.shape_cast %18 : vector<2x16x64xf32> to vector<32x64xf32>
    %c2_28 = arith.constant 2 : index
    %c0_29 = arith.constant 0 : index
    %c0_30 = arith.constant 0 : index
    %20 = vector.load %arg1[%c2_28, %c0_29, %c0_30] : memref<3x64x128xf32, #tpu.memory_space<vmem>>, vector<1x64x128xf32>
    %21 = vector.shape_cast %20 : vector<1x64x128xf32> to vector<64x128xf32>
    %cst_31 = arith.constant dense<0.000000e+00> : vector<32x128xf32>
    %22 = tpu.matmul %19, %21, %cst_31 {dimension_numbers = #tpu.dot_dimension_numbers<[1], [0], [0], [1], [0, 0, 1, 1], [], []>} : vector<32x64xf32>, vector<64x128xf32>, vector<32x128xf32> -> vector<32x128xf32>
    %23 = arith.addf %17, %22 : vector<32x128xf32>
    %c0_32 = arith.constant 0 : index
    %c0_33 = arith.constant 0 : index
    %24 = vector.load %arg2[%c0_32, %c0_33] : memref<1x128xf32, #tpu.memory_space<vmem>>, vector<1x128xf32>
    %c0_34 = arith.constant 0 : index
    %c0_35 = arith.constant 0 : index
    %25 = vector.load %arg3[%c0_34, %c0_35] : memref<1x128xf32, #tpu.memory_space<vmem>>, vector<1x128xf32>
    %cst_36 = arith.constant dense<0.000000e+00> : vector<8x128xf32>
    %26 = tpu.matmul %1, %23, %cst_36 {dimension_numbers = #tpu.dot_dimension_numbers<[1], [0], [0], [1], [0, 0, 1, 1], [], []>} : vector<8x32xf32>, vector<32x128xf32>, vector<8x128xf32> -> vector<8x128xf32>
    %27 = vector.extract_strided_slice %26 {offsets = [0, 0], sizes = [1, 128], strides = [1, 1]} : vector<8x128xf32> to vector<1x128xf32>
    %cst_37 = arith.constant dense<0.000000e+00> : vector<1x128xf32>
    %28 = tpu.matmul %27, %0, %cst_37 {dimension_numbers = #tpu.dot_dimension_numbers<[1], [0], [0], [1], [0, 0, 1, 1], [], []>} : vector<1x128xf32>, vector<128x128xf32>, vector<1x128xf32> -> vector<1x128xf32>
    %cst_38 = arith.constant 0.001953125 : f32
    %29 = vector.broadcast %cst_38 : f32 to vector<1x128xf32>
    %30 = arith.mulf %28, %29 : vector<1x128xf32>
    %31 = vector.broadcast %30 : vector<1x128xf32> to vector<32x128xf32>
    %32 = arith.subf %23, %31 : vector<32x128xf32>
    %33 = arith.mulf %32, %32 : vector<32x128xf32>
    %cst_39 = arith.constant dense<0.000000e+00> : vector<8x128xf32>
    %34 = tpu.matmul %1, %33, %cst_39 {dimension_numbers = #tpu.dot_dimension_numbers<[1], [0], [0], [1], [0, 0, 1, 1], [], []>} : vector<8x32xf32>, vector<32x128xf32>, vector<8x128xf32> -> vector<8x128xf32>
    %35 = vector.extract_strided_slice %34 {offsets = [0, 0], sizes = [1, 128], strides = [1, 1]} : vector<8x128xf32> to vector<1x128xf32>
    %cst_40 = arith.constant dense<0.000000e+00> : vector<1x128xf32>
    %36 = tpu.matmul %35, %0, %cst_40 {dimension_numbers = #tpu.dot_dimension_numbers<[1], [0], [0], [1], [0, 0, 1, 1], [], []>} : vector<1x128xf32>, vector<128x128xf32>, vector<1x128xf32> -> vector<1x128xf32>
    %cst_41 = arith.constant 0.001953125 : f32
    %37 = vector.broadcast %cst_41 : f32 to vector<1x128xf32>
    %38 = arith.mulf %36, %37 : vector<1x128xf32>
    %cst_42 = arith.constant 9.99999974E-6 : f32
    %39 = vector.broadcast %cst_42 : f32 to vector<1x128xf32>
    %40 = arith.addf %38, %39 : vector<1x128xf32>
    %41 = math.rsqrt %40 : vector<1x128xf32>
    %42 = vector.broadcast %41 : vector<1x128xf32> to vector<32x128xf32>
    %43 = arith.mulf %32, %42 : vector<32x128xf32>
    %44 = vector.broadcast %24 : vector<1x128xf32> to vector<32x128xf32>
    %45 = arith.mulf %43, %44 : vector<32x128xf32>
    %46 = vector.broadcast %25 : vector<1x128xf32> to vector<32x128xf32>
    %47 = arith.addf %45, %46 : vector<32x128xf32>
    %cst_43 = arith.constant 0.000000e+00 : f32
    %48 = vector.broadcast %cst_43 : f32 to vector<32x128xf32>
    %49 = arith.maximumf %47, %48 : vector<32x128xf32>
    %cst_44 = arith.constant 0.000000e+00 : f32
    %50 = vector.broadcast %cst_44 : f32 to vector<2x1x128xf32>
    %c0_45 = arith.constant 0 : index
    %c0_46 = arith.constant 0 : index
    %c0_47 = arith.constant 0 : index
    %51 = vector.load %arg12[%c0_45, %c0_46, %c0_47] : memref<2x18x128xf32, #tpu.memory_space<vmem>>, vector<2x1x128xf32>
    tpu.vector_store %arg12[%c0_45, %c0_46, %c0_47], %50 {strides = array<i32>} : memref<2x18x128xf32, #tpu.memory_space<vmem>>, vector<2x1x128xf32>,
    %c0_48 = arith.constant 0 : index
    %c17_49 = arith.constant 17 : index
    %c0_50 = arith.constant 0 : index
    %52 = vector.load %arg12[%c0_48, %c17_49, %c0_50] : memref<2x18x128xf32, #tpu.memory_space<vmem>>, vector<2x1x128xf32>
    tpu.vector_store %arg12[%c0_48, %c17_49, %c0_50], %50 {strides = array<i32>} : memref<2x18x128xf32, #tpu.memory_space<vmem>>, vector<2x1x128xf32>,
    %53 = vector.shape_cast %49 : vector<32x128xf32> to vector<2x16x128xf32>
    %c0_51 = arith.constant 0 : index
    %c1_52 = arith.constant 1 : index
    %c0_53 = arith.constant 0 : index
    %54 = vector.load %arg12[%c0_51, %c1_52, %c0_53] : memref<2x18x128xf32, #tpu.memory_space<vmem>>, vector<2x16x128xf32>
    tpu.vector_store %arg12[%c0_51, %c1_52, %c0_53], %53 {strides = array<i32>} : memref<2x18x128xf32, #tpu.memory_space<vmem>>, vector<2x16x128xf32>,
    %c0_54 = arith.constant 0 : index
    %c0_55 = arith.constant 0 : index
    %c0_56 = arith.constant 0 : index
    %55 = vector.load %arg12[%c0_54, %c0_55, %c0_56] : memref<2x18x128xf32, #tpu.memory_space<vmem>>, vector<2x16x128xf32>
    %56 = vector.shape_cast %55 : vector<2x16x128xf32> to vector<32x128xf32>
    %c0_57 = arith.constant 0 : index
    %c0_58 = arith.constant 0 : index
    %c0_59 = arith.constant 0 : index
    %57 = vector.load %arg4[%c0_57, %c0_58, %c0_59] : memref<3x128x128xf32, #tpu.memory_space<vmem>>, vector<1x128x128xf32>
    %58 = vector.shape_cast %57 : vector<1x128x128xf32> to vector<128x128xf32>
    %cst_60 = arith.constant dense<0.000000e+00> : vector<32x128xf32>
    %59 = tpu.matmul %56, %58, %cst_60 {dimension_numbers = #tpu.dot_dimension_numbers<[1], [0], [0], [1], [0, 0, 1, 1], [], []>} : vector<32x128xf32>, vector<128x128xf32>, vector<32x128xf32> -> vector<32x128xf32>
    %c0_61 = arith.constant 0 : index
    %c1_62 = arith.constant 1 : index
    %c0_63 = arith.constant 0 : index
    %60 = vector.load %arg12[%c0_61, %c1_62, %c0_63] : memref<2x18x128xf32, #tpu.memory_space<vmem>>, vector<2x16x128xf32>
    %61 = vector.shape_cast %60 : vector<2x16x128xf32> to vector<32x128xf32>
    %c1_64 = arith.constant 1 : index
    %c0_65 = arith.constant 0 : index
    %c0_66 = arith.constant 0 : index
    %62 = vector.load %arg4[%c1_64, %c0_65, %c0_66] : memref<3x128x128xf32, #tpu.memory_space<vmem>>, vector<1x128x128xf32>
    %63 = vector.shape_cast %62 : vector<1x128x128xf32> to vector<128x128xf32>
    %cst_67 = arith.constant dense<0.000000e+00> : vector<32x128xf32>
    %64 = tpu.matmul %61, %63, %cst_67 {dimension_numbers = #tpu.dot_dimension_numbers<[1], [0], [0], [1], [0, 0, 1, 1], [], []>} : vector<32x128xf32>, vector<128x128xf32>, vector<32x128xf32> -> vector<32x128xf32>
    %65 = arith.addf %59, %64 : vector<32x128xf32>
    %c0_68 = arith.constant 0 : index
    %c2_69 = arith.constant 2 : index
    %c0_70 = arith.constant 0 : index
    %66 = vector.load %arg12[%c0_68, %c2_69, %c0_70] : memref<2x18x128xf32, #tpu.memory_space<vmem>>, vector<2x16x128xf32>
    %67 = vector.shape_cast %66 : vector<2x16x128xf32> to vector<32x128xf32>
    %c2_71 = arith.constant 2 : index
    %c0_72 = arith.constant 0 : index
    %c0_73 = arith.constant 0 : index
    %68 = vector.load %arg4[%c2_71, %c0_72, %c0_73] : memref<3x128x128xf32, #tpu.memory_space<vmem>>, vector<1x128x128xf32>
    %69 = vector.shape_cast %68 : vector<1x128x128xf32> to vector<128x128xf32>
    %cst_74 = arith.constant dense<0.000000e+00> : vector<32x128xf32>
    %70 = tpu.matmul %67, %69, %cst_74 {dimension_numbers = #tpu.dot_dimension_numbers<[1], [0], [0], [1], [0, 0, 1, 1], [], []>} : vector<32x128xf32>, vector<128x128xf32>, vector<32x128xf32> -> vector<32x128xf32>
    %71 = arith.addf %65, %70 : vector<32x128xf32>
    %c0_75 = arith.constant 0 : index
    %c0_76 = arith.constant 0 : index
    %72 = vector.load %arg5[%c0_75, %c0_76] : memref<1x128xf32, #tpu.memory_space<vmem>>, vector<1x128xf32>
    %c0_77 = arith.constant 0 : index
    %c0_78 = arith.constant 0 : index
    %73 = vector.load %arg6[%c0_77, %c0_78] : memref<1x128xf32, #tpu.memory_space<vmem>>, vector<1x128xf32>
    %cst_79 = arith.constant dense<0.000000e+00> : vector<8x128xf32>
    %74 = tpu.matmul %1, %71, %cst_79 {dimension_numbers = #tpu.dot_dimension_numbers<[1], [0], [0], [1], [0, 0, 1, 1], [], []>} : vector<8x32xf32>, vector<32x128xf32>, vector<8x128xf32> -> vector<8x128xf32>
    %75 = vector.extract_strided_slice %74 {offsets = [0, 0], sizes = [1, 128], strides = [1, 1]} : vector<8x128xf32> to vector<1x128xf32>
    %cst_80 = arith.constant dense<0.000000e+00> : vector<1x128xf32>
    %76 = tpu.matmul %75, %0, %cst_80 {dimension_numbers = #tpu.dot_dimension_numbers<[1], [0], [0], [1], [0, 0, 1, 1], [], []>} : vector<1x128xf32>, vector<128x128xf32>, vector<1x128xf32> -> vector<1x128xf32>
    %cst_81 = arith.constant 0.001953125 : f32
    %77 = vector.broadcast %cst_81 : f32 to vector<1x128xf32>
    %78 = arith.mulf %76, %77 : vector<1x128xf32>
    %79 = vector.broadcast %78 : vector<1x128xf32> to vector<32x128xf32>
    %80 = arith.subf %71, %79 : vector<32x128xf32>
    %81 = arith.mulf %80, %80 : vector<32x128xf32>
    %cst_82 = arith.constant dense<0.000000e+00> : vector<8x128xf32>
    %82 = tpu.matmul %1, %81, %cst_82 {dimension_numbers = #tpu.dot_dimension_numbers<[1], [0], [0], [1], [0, 0, 1, 1], [], []>} : vector<8x32xf32>, vector<32x128xf32>, vector<8x128xf32> -> vector<8x128xf32>
    %83 = vector.extract_strided_slice %82 {offsets = [0, 0], sizes = [1, 128], strides = [1, 1]} : vector<8x128xf32> to vector<1x128xf32>
    %cst_83 = arith.constant dense<0.000000e+00> : vector<1x128xf32>
    %84 = tpu.matmul %83, %0, %cst_83 {dimension_numbers = #tpu.dot_dimension_numbers<[1], [0], [0], [1], [0, 0, 1, 1], [], []>} : vector<1x128xf32>, vector<128x128xf32>, vector<1x128xf32> -> vector<1x128xf32>
    %cst_84 = arith.constant 0.001953125 : f32
    %85 = vector.broadcast %cst_84 : f32 to vector<1x128xf32>
    %86 = arith.mulf %84, %85 : vector<1x128xf32>
    %cst_85 = arith.constant 9.99999974E-6 : f32
    %87 = vector.broadcast %cst_85 : f32 to vector<1x128xf32>
    %88 = arith.addf %86, %87 : vector<1x128xf32>
    %89 = math.rsqrt %88 : vector<1x128xf32>
    %90 = vector.broadcast %89 : vector<1x128xf32> to vector<32x128xf32>
    %91 = arith.mulf %80, %90 : vector<32x128xf32>
    %92 = vector.broadcast %72 : vector<1x128xf32> to vector<32x128xf32>
    %93 = arith.mulf %91, %92 : vector<32x128xf32>
    %94 = vector.broadcast %73 : vector<1x128xf32> to vector<32x128xf32>
    %95 = arith.addf %93, %94 : vector<32x128xf32>
    %cst_86 = arith.constant 0.000000e+00 : f32
    %96 = vector.broadcast %cst_86 : f32 to vector<32x128xf32>
    %97 = arith.maximumf %95, %96 : vector<32x128xf32>
    %c0_87 = arith.constant 0 : index
    %c0_88 = arith.constant 0 : index
    %98 = vector.load %arg8[%c0_87, %c0_88] : memref<128x256xf32, #tpu.memory_space<vmem>>, vector<128x256xf32>
    %cst_89 = arith.constant dense<0.000000e+00> : vector<32x256xf32>
    %99 = tpu.matmul %97, %98, %cst_89 {dimension_numbers = #tpu.dot_dimension_numbers<[1], [0], [0], [1], [0, 0, 1, 1], [], []>} : vector<32x128xf32>, vector<128x256xf32>, vector<32x256xf32> -> vector<32x256xf32>
    %c0_90 = arith.constant 0 : index
    %c0_91 = arith.constant 0 : index
    %100 = vector.load %arg9[%c0_90, %c0_91] : memref<1x256xf32, #tpu.memory_space<vmem>>, vector<1x256xf32>
    %101 = vector.broadcast %100 : vector<1x256xf32> to vector<32x256xf32>
    %102 = arith.addf %99, %101 : vector<32x256xf32>
    %c0_92 = arith.constant 0 : index
    %c0_93 = arith.constant 0 : index
    %103 = vector.load %arg10[%c0_92, %c0_93] : memref<32x256xf32, #tpu.memory_space<vmem>>, vector<32x256xf32>
    tpu.vector_store %arg10[%c0_92, %c0_93], %102 {strides = array<i32>} : memref<32x256xf32, #tpu.memory_space<vmem>>, vector<32x256xf32>,
    return
  }
}

</mosaic_0001>

<bundles_post_ra>
// kernel: bottleneck_forward.1
= control target key start
LH: loop header
LB: loop body
LE: loop exit
PB: predicated region body
PF: predicated region fallthrough
CT: control target
= control target key end

     0   :  { %15 = vsyncpa [#allocation5], 0  ;;  %s2821_s0 = inlined_call_operand.vmem [shape: f32[2,16,64], index: 0, kind: input, shape index: {}]   ;;  %s2822_s1 = inlined_call_operand.hbm [shape: f32[3,64,128], index: 1, kind: input, shape index: {}]   ;;  %s2823_s2 = inlined_call_operand.vmem [shape: f32[1,128], index: 2, kind: input, shape index: {}]   ;;  %s2824_s3 = inlined_call_operand.vmem [shape: f32[1,128], index: 3, kind: input, shape index: {}]   ;;  %s2825_s4 = inlined_call_operand.vmem [shape: f32[3,128,128], index: 4, kind: input, shape index: {}]   ;;  %s2826_s5 = inlined_call_operand.vmem [shape: f32[1,128], index: 5, kind: input, shape index: {}]   ;;  %s2827_s6 = inlined_call_operand.vmem [shape: f32[1,128], index: 6, kind: input, shape index: {}]   ;;  %s2828_s7 = inlined_call_operand.hbm [shape: f32[128,128], index: 7, kind: input, shape index: {}]   ;;  %s2829_s8 = inlined_call_operand.hbm [shape: f32[128,256], index: 8, kind: input, shape index: {}]   ;;  %s2830_s9 = inlined_call_operand.vmem [shape: f32[1,256], index: 9, kind: input, shape index: {}]   ;;  %s2831_s10 = inlined_call_operand.vmem [shape: f32[32,256], index: 10, kind: output, shape index: {}]  }
   0x1   :  { %16 = vsyncpa [#allocation7], 0  ;;  %s2257_s13 = smov [#allocation6]   ;;  %s2258_s15 = smov [#allocation4]  }
   0x2   :  { %s46_s14 = sshll.u32 %s2257_s13, 4  ;;  %s24_s16 = sshll.u32 %s2258_s15, 4  ;;  %s47_s14 = int_to_ptr.vmem [resolvable:$true] %s46_s14  ;;  %s25_s16 = int_to_ptr.vmem [resolvable:$true] %s24_s16 }
   0x3   :  { %s2201_s17 = scalar_lea.vmem %s47_s14, 2048  ;;  %p2206_p1 = scmp.lt.s32.totalorder %s47_s14, %s47_s14 }
   0x4   :  { %p2202_p0 = scmp.ne.s32.totalorder %s47_s14, %s2201_s17  ;;  %p2207_p2 = scmp.lt.s32.totalorder %s2201_s17, %s2201_s17 }
   0x6   :  { %p2208_p3 = por %p2207_p2, %p2206_p1 }
   0x8   :  { %p2209_p4 = pnand %p2208_p3, %p2202_p0 }
   0xa   :  { %2212 = shalt.err (!%p2209_p4)
}
   0xb   :  { %s2259_s18 = smov 128   ;;  %s2260_s19 = smov 8  }
   0xc   :  { %52 = dma.hbm_to_vmem [thread:$0]  %s2828_s7, 2048, %s47_s14, [#allocation7], %s2259_s18, %s2259_s18, %s2260_s19  }
   0xd   :  { %s2221_s22 = scalar_lea.vmem %s25_s16, 3072  ;;  %p2226_p6 = scmp.lt.s32.totalorder %s25_s16, %s25_s16 }
   0xe   :  { %p2222_p5 = scmp.ne.s32.totalorder %s25_s16, %s2221_s22  ;;  %p2227_p7 = scmp.lt.s32.totalorder %s2221_s22, %s2221_s22 }
  0x10   :  { %p2228_p8 = por %p2227_p7, %p2226_p6 }
  0x12   :  { %p2229_p9 = pnand %p2228_p8, %p2222_p5 }
  0x14   :  { %2232 = shalt.err (!%p2229_p9)
}
  0x15   :  { %30 = dma.hbm_to_vmem [thread:$0]  %s2822_s1, 3072, %s25_s16, [#allocation5], %s2259_s18, %s2259_s18, %s2260_s19  }
  0x16   :  { %s2261_s25 = smov [#allocation8]  }
  0x17   :  { %s58_s26 = sshll.u32 %s2261_s25, 4  ;;  %s59_s26 = int_to_ptr.vmem [resolvable:$true] %s58_s26 }
  0x18   :  { %s2241_s27 = scalar_lea.vmem %s59_s26, 4096  ;;  %p2246_p11 = scmp.lt.s32.totalorder %s59_s26, %s59_s26 }
  0x19   :  { %p2242_p10 = scmp.ne.s32.totalorder %s59_s26, %s2241_s27  ;;  %p2247_p12 = scmp.lt.s32.totalorder %s2241_s27, %s2241_s27 }
  0x1b   :  { %p2248_p13 = por %p2247_p12, %p2246_p11 }
  0x1d   :  { %p2249_p0 = pnand %p2248_p13, %p2242_p10 }
  0x1f   :  { %2252 = shalt.err (!%p2249_p0)
}
  0x20   :  { %s2262_s7 = smov 256   ;;  %s2263_s28 = smov 16  }
  0x21   :  { %64 = dma.hbm_to_vmem [thread:$0]  %s2829_s8, 4096, %s59_s26, [#allocation7], %s2262_s7, %s2262_s7, %s2263_s28  }
  0x22   :  { %2253 = dma.done.wait [#allocation5], 3072  }
  0x23   :  { %2254 = vsyncadd [#allocation5], 4294964224 }
  0x24   :  { %2255 = dma.done.wait [#allocation7], 6144  }
  0x25   :  { %2256 = vsyncadd [#allocation7], 4294961152  ;;  %vm92_vm0 = vcmask 516096   ;;  %v2264_v0 = vmov 0.0   ;;  %v130_v1 = vld [vmem:[#allocation4 + $0x78] sm:$0xff]  ;;  %v129_v2 = vld [vmem:[#allocation4 + $0x70] sm:$0xff] }
  0x26   :  { %93 = vst.msk [vmem:[#allocation2] sm:$0x1] %vm92_vm0, %v2264_v0  ;;  %94 = vst.msk [vmem:[#allocation2 + $0x18] sm:$0x1] %vm92_vm0, %v2264_v0  ;;  %vm101_vm1 = vcmask 523264   ;;  %1815 = vmatprep.subr.mxu1 %v130_v1  ;;  %v128_v3 = vld [vmem:[#allocation4 + $0x68] sm:$0xff] }
  0x27   :  { %95 = vst.msk [vmem:[#allocation2 + $0x11] sm:$0x1] %vm92_vm0, %v2264_v0  ;;  %96 = vst.msk [vmem:[#allocation2 + $0x29] sm:$0x1] %vm92_vm0, %v2264_v0  ;;  %1816 = vmatpush3.msra.mxu1 %v130_v1  ;;  %v97_v4 = vld [vmem:[%s2821_s0] sm:$0xff]  ;;  %v98_v5 = vld [vmem:[%s2821_s0 + $0x8] sm:$0xff] }
  0x28   :  { %773 = vst [vmem:[#allocation3] sm:$0x1] %v2264_v0  ;;  %774 = vst [vmem:[#allocation3 + $0x18] sm:$0x1] %v2264_v0  ;;  %1817 = vmatprep.subr.mxu1 %v129_v2  ;;  %v337_v6 = vld [vmem:[#allocation4 + $0xb8] sm:$0xff]  ;;  %v127_v7 = vld [vmem:[#allocation4 + $0x60] sm:$0xff] }
  0x29   :  { %775 = vst [vmem:[#allocation3 + $0x11] sm:$0x1] %v2264_v0  ;;  %776 = vst [vmem:[#allocation3 + $0x29] sm:$0x1] %v2264_v0  ;;  %1818 = vmatpush3.msra.mxu1 %v129_v2  ;;  %1859 = vmatprep.subr.mxu0 %v337_v6  ;;  %v336_v8 = vld [vmem:[#allocation4 + $0xb0] sm:$0xff]  ;;  %v335_v9 = vld [vmem:[#allocation4 + $0xa8] sm:$0xff] }
  0x2a   :  { %102 = vst.msk [vmem:[#allocation2 + $0x1] sm:$0xff] %vm101_vm1, %v97_v4  ;;  %103 = vst.msk [vmem:[#allocation2 + $0x9] sm:$0xff] %vm101_vm1, %v98_v5  ;;  %1819 = vmatprep.subr.mxu1 %v128_v3  ;;  %1860 = vmatpush3.msra.mxu0 %v337_v6  ;;  %v126_v10 = vld [vmem:[#allocation4 + $0x58] sm:$0xff]  ;;  %v99_v11 = vld [vmem:[%s2821_s0 + $0x10] sm:$0xff]  ;;  %vm2265_vm2 = vmmov 0   ;;  %vm441_vm3 = vcmask 261120  }
  0x2b   :  { %1820 = vmatpush3.msra.mxu1 %v128_v3  ;;  %1861 = vmatprep.subr.mxu0 %v336_v8  ;;  %v334_v12 = vld [vmem:[#allocation4 + $0xa0] sm:$0xff]  ;;  %104 = vst.msk [vmem:[#allocation2 + $0x19] sm:$0xff] %vm101_vm1, %v99_v11  ;;  %v100_v13 = vld [vmem:[%s2821_s0 + $0x18] sm:$0xff]  ;;  %v125_v14 = vld [vmem:[#allocation4 + $0x50] sm:$0xff]  ;;  %v2266_v62 = vmov 1.0  }
  0x2c   :  { %1821 = vmatprep.subr.mxu1 %v127_v7  ;;  %1862 = vmatpush3.msra.mxu0 %v336_v8  ;;  %105 = vst.msk [vmem:[#allocation2 + $0x21] sm:$0xff] %vm101_vm1, %v100_v13  ;;  %v124_v15 = vld [vmem:[#allocation4 + $0x48] sm:$0xff]  ;;  %v333_v17 = vld [vmem:[#allocation4 + $0x98] sm:$0xff]  ;;  %v123_v18 = vld [vmem:[#allocation4 + $0x40] sm:$0xff] }
  0x2d   :  { %1822 = vmatpush3.msra.mxu1 %v127_v7  ;;  %1863 = vmatprep.subr.mxu0 %v335_v9  ;;  %v332_v19 = vld [vmem:[#allocation4 + $0x90] sm:$0xff]  ;;  %v117_v21 = vld [vmem:[#allocation4 + $0x38] sm:$0xff]  ;;  %v331_v24 = vld [vmem:[#allocation4 + $0x88] sm:$0xff] }
  0x2e   :  { %1823 = vmatprep.subr.mxu1 %v126_v10  ;;  %1864 = vmatpush3.msra.mxu0 %v335_v9  ;;  %v116_v23 = vld [vmem:[#allocation4 + $0x30] sm:$0xff]  ;;  %v115_v25 = vld [vmem:[#allocation4 + $0x28] sm:$0xff]  ;;  %v330_v27 = vld [vmem:[#allocation4 + $0x80] sm:$0xff] }
  0x2f   :  { %1824 = vmatpush3.msra.mxu1 %v126_v10  ;;  %1865 = vmatprep.subr.mxu0 %v334_v12  ;;  %v114_v28 = vld [vmem:[#allocation4 + $0x20] sm:$0xff]  ;;  %v113_v30 = vld [vmem:[#allocation4 + $0x18] sm:$0xff]  ;;  %v112_v33 = vld [vmem:[#allocation4 + $0x10] sm:$0xff] }
  0x30   :  { %1825 = vmatprep.subr.mxu1 %v125_v14  ;;  %1866 = vmatpush3.msra.mxu0 %v334_v12  ;;  %v111_v35 = vld [vmem:[#allocation4 + $0x8] sm:$0xff]  ;;  %v110_v37 = vld [vmem:[#allocation4] sm:$0xff]  ;;  %v2387_v61 = vld [vmem:[#allocation6 + $0x78] sm:$0xff] }
  0x31   :  { %v118_v16 = vld [vmem:[#allocation2 + $0x1] sm:$0xff]  ;;  %1826 = vmatpush3.msra.mxu1 %v125_v14  ;;  %1867 = vmatprep.subr.mxu0 %v333_v17  ;;  %v119_v20 = vld [vmem:[#allocation2 + $0x9] sm:$0xff]  ;;  %v2407_v3 = vld [vmem:[#allocation6 + $0x58] sm:$0xff] }
  0x32   :  { %1831 = vmatprep.mubr.msk.f32.mxu1 %vm101_vm1, %v118_v16  ;;  %1827 = vmatprep.subr.mxu1 %v124_v15  ;;  %v120_v22 = vld [vmem:[#allocation2 + $0x19] sm:$0xff]  ;;  %v325_v31 = vld [vmem:[#allocation2 + $0x2] sm:$0xff]  ;;  %v326_v32 = vld [vmem:[#allocation2 + $0xa] sm:$0xff] }
  0x33   :  { %1828 = vmatpush3.msra.mxu1 %v124_v15  ;;  %1868 = vmatpush3.msra.mxu0 %v333_v17  ;;  %v121_v26 = vld [vmem:[#allocation2 + $0x21] sm:$0xff]  ;;  %v108_v39 = vld [vmem:[#allocation2 + $0x18] sm:$0xff]  ;;  %v2393_v63 = vld [vmem:[#allocation6 + $0x70] sm:$0xff]  ;;  %v586_v17 = vlaneseq }
  0x34   :  { %1829 = vmatprep.subr.mxu1 %v123_v18  ;;  %1869 = vmatprep.subr.mxu0 %v332_v19  ;;  %v106_v29 = vld [vmem:[#allocation2] sm:$0xff]  ;;  %v107_v38 = vld [vmem:[#allocation2 + $0x8] sm:$0xff]  ;;  %v2411_v4 = vld [vmem:[#allocation6 + $0x50] sm:$0xff] }
  0x35   :  { %1830 = vmatpush3.msra.mxu1 %v123_v18  ;;  %1870 = vmatpush3.msra.mxu0 %v332_v19  ;;  %v327_v34 = vld [vmem:[#allocation2 + $0x1a] sm:$0xff]  ;;  %v328_v36 = vld [vmem:[#allocation2 + $0x22] sm:$0xff]  ;;  %v2427_v8 = vld [vmem:[#allocation6 + $0x30] sm:$0xff]  ;;  %v2456_v18 = vshrl.u32 %v586_v17, 7 }
  0x36   :  { %1832 = vmatmul.mubr.msk.f32.vlgmr.msra.gmra.mxu1 %vm101_vm1, %v119_v20  ;;  %1837 = vmatprep.subr.mxu1 %v117_v21  ;;  %v109_v40 = vld [vmem:[#allocation2 + $0x20] sm:$0xff]  ;;  %v2399_v1 = vld [vmem:[#allocation6 + $0x68] sm:$0xff]  ;;  %v2423_v7 = vld [vmem:[#allocation6 + $0x38] sm:$0xff] }
  0x37   :  { %1838 = vmatpush3.msra.mxu1 %v117_v21  ;;  %1834 = vmatprep.mubr.msk.f32.mxu1 %vm101_vm1, %v120_v22  ;;  %v2403_v2 = vld [vmem:[#allocation6 + $0x60] sm:$0xff]  ;;  %v2415_v5 = vld [vmem:[#allocation6 + $0x48] sm:$0xff]  ;;  %v2439_v11 = vld [vmem:[#allocation6 + $0x18] sm:$0xff]  ;;  %v2459_v19 = vsub.s32 0, %v2456_v18 }
  0x38   :  { %1839 = vmatprep.subr.mxu1 %v116_v23  ;;  %1871 = vmatprep.subr.mxu0 %v331_v24  ;;  %v2419_v6 = vld [vmem:[#allocation6 + $0x40] sm:$0xff]  ;;  %v2431_v9 = vld [vmem:[#allocation6 + $0x28] sm:$0xff]  ;;  %v2443_v12 = vld [vmem:[#allocation6 + $0x10] sm:$0xff] }
  0x39   :  { %1840 = vmatpush3.msra.mxu1 %v116_v23  ;;  %1872 = vmatpush3.msra.mxu0 %v331_v24  ;;  %v2435_v10 = vld [vmem:[#allocation6 + $0x20] sm:$0xff]  ;;  %v2447_v13 = vld [vmem:[#allocation6 + $0x8] sm:$0xff]  ;;  %v788_v17 = vld [vmem:[%s2825_s4 + $0x18] sm:$0xff] }
  0x3a   :  { %1841 = vmatprep.subr.mxu1 %v115_v25  ;;  %1835 = vmatmul.mubr.msk.f32.gmra.mxu1 %vm101_vm1, %v121_v26  ;;  %v2453_v14 = vld [vmem:[#allocation6] sm:$0xff] }
  0x3b   :  { %1842 = vmatpush3.msra.mxu1 %v115_v25  ;;  %1873 = vmatprep.subr.mxu0 %v330_v27 }
  0x3c   :  { %1843 = vmatprep.subr.mxu1 %v114_v28  ;;  %1853 = vmatprep.mubr.msk.f32.mxu1 %vm101_vm1, %v106_v29 }
  0x3d   :  { %1844 = vmatpush3.msra.mxu1 %v114_v28  ;;  %1874 = vmatpush3.msra.mxu0 %v330_v27 }
  0x3e   :  { %1845 = vmatprep.subr.mxu1 %v113_v30  ;;  %1875 = vmatprep.mubr.msk.f32.mxu0 %vm101_vm1, %v325_v31 }
  0x3f   :  { %1846 = vmatpush3.msra.mxu1 %v113_v30  ;;  %1876 = vmatmul.mubr.msk.f32.vlgmr.msra.gmra.mxu0 %vm101_vm1, %v326_v32 }
  0x40   :  { %1847 = vmatprep.subr.mxu1 %v112_v33  ;;  %1878 = vmatprep.mubr.msk.f32.mxu0 %vm101_vm1, %v327_v34  ;;  %v1610_v34 = vld [vmem:[%s2825_s4 + $0xf8] sm:$0xff] }
  0x41   :  { %1848 = vmatpush3.msra.mxu1 %v112_v33  ;;  %1927 = vmatprep.subr.mxu0 %v2264_v0 }
  0x42   :  { %1849 = vmatprep.subr.mxu1 %v111_v35 }
  0x43   :  { %1850 = vmatpush3.msra.mxu1 %v111_v35  ;;  %1879 = vmatmul.mubr.msk.f32.gmra.mxu0 %vm101_vm1, %v328_v36  ;;  %v1609_v35 = vld [vmem:[%s2825_s4 + $0xf0] sm:$0xff]  ;;  %v1608_v36 = vld [vmem:[%s2825_s4 + $0xe8] sm:$0xff] }
  0x44   :  { %1851 = vmatprep.subr.mxu1 %v110_v37  ;;  %1935 = vmatprep.mubr.msk.f32.mxu0 %vm2265_vm2, %v2264_v0 }
  0x45   :  { %1852 = vmatpush3.msra.mxu1 %v110_v37  ;;  %v1607_v37 = vld [vmem:[%s2825_s4 + $0xe0] sm:$0xff] }
  0x46   :  { %1854 = vmatmul.mubr.msk.f32.vlgmr.msra.gmra.mxu1 %vm101_vm1, %v107_v38  ;;  %1881 = vmatprep.subr.mxu1 %v2264_v0  ;;  %v1606_v38 = vld [vmem:[%s2825_s4 + $0xd8] sm:$0xff] }
  0x47   :  { %1856 = vmatprep.mubr.msk.f32.mxu1 %vm101_vm1, %v108_v39  ;;  %v800_v39 = vld [vmem:[%s2825_s4 + $0x78] sm:$0xff] }
  0x4a   :  { %1857 = vmatmul.mubr.msk.f32.gmra.mxu1 %vm101_vm1, %v109_v40  ;;  %v1605_v40 = vld [vmem:[%s2825_s4 + $0xd0] sm:$0xff] }
  0x4b   :  { %1889 = vmatprep.mubr.msk.f32.mxu1 %vm2265_vm2, %v2264_v0 }
  0xf6   :  { %v1833_v41 = vpop.f32.mrf.mxu1 }
  0xf8   :  { %v209_v42 = vpop.f32.mrf.mxu1 }
  0xfa   :  { %v1836_v43 = vpop.f32.mrf.mxu1 }
  0xfc   :  { %v219_v45 = vpop.f32.mrf.mxu1 }
  0xff   :  { %v1877_v44 = vpop.f32.mrf.mxu0 }
 0x101   :  { %v416_v47 = vpop.f32.mrf.mxu0 }
 0x103   :  { %v1880_v50 = vpop.f32.mrf.mxu0 }
 0x105   :  { %v426_v56 = vpop.f32.mrf.mxu0 }
 0x106   :  { %v1855_v46 = vpop.f32.mrf.mxu1 }
 0x107   :  { %v312_v53 = vadd.f32 %v1855_v46, %v1833_v41  ;;  %v799_v41 = vld [vmem:[%s2825_s4 + $0x70] sm:$0xff]  ;;  %v1602_v46 = vld [vmem:[%s2825_s4 + $0xb8] sm:$0xff] }
 0x108   :  { %v306_v48 = vpop.f32.mrf.mxu1 }
 0x109   :  { %v307_v57 = vadd.f32 %v306_v48, %v209_v42  ;;  %v2379_v59 = vadd.f32 %v1877_v44, %v312_v53  ;;  %v1604_v42 = vld [vmem:[%s2825_s4 + $0xc8] sm:$0xff]  ;;  %v1603_v44 = vld [vmem:[%s2825_s4 + $0xc0] sm:$0xff]  ;;  %v1601_v48 = vld [vmem:[%s2825_s4 + $0xb0] sm:$0xff] }
 0x10a   :  { %v1858_v49 = vpop.f32.mrf.mxu1  ;;  %v793_v53 = vld [vmem:[%s2825_s4 + $0x40] sm:$0xff] }
 0x10b   :  { %v322_v51 = vadd.f32 %v1858_v49, %v1836_v43  ;;  %v2383_v60 = vadd.f32 %v416_v47, %v307_v57  ;;  %v798_v43 = vld [vmem:[%s2825_s4 + $0x68] sm:$0xff]  ;;  %v796_v47 = vld [vmem:[%s2825_s4 + $0x58] sm:$0xff]  ;;  %v795_v49 = vld [vmem:[%s2825_s4 + $0x50] sm:$0xff] }
 0x10c   :  { %v316_v52 = vpop.f32.mrf.mxu1  ;;  %v791_v57 = vld [vmem:[%s2825_s4 + $0x30] sm:$0xff] }
 0x10d   :  { %v2373_v54 = vadd.f32 %v1880_v50, %v322_v51  ;;  %v317_v55 = vadd.f32 %v316_v52, %v219_v45  ;;  %v797_v45 = vld [vmem:[%s2825_s4 + $0x60] sm:$0xff]  ;;  %v1600_v50 = vld [vmem:[%s2825_s4 + $0xa8] sm:$0xff] }
 0x10e   :  { %v794_v51 = vld [vmem:[%s2825_s4 + $0x48] sm:$0xff]  ;;  %v1599_v52 = vld [vmem:[%s2825_s4 + $0xa0] sm:$0xff] }
 0x10f   :  { %v2375_v58 = vadd.f32 %v426_v56, %v317_v55  ;;  %1882 = vmatpush3.msra.mxu1 %v2373_v54  ;;  %v792_v55 = vld [vmem:[%s2825_s4 + $0x38] sm:$0xff]  ;;  %v1597_v56 = vld [vmem:[%s2825_s4 + $0x90] sm:$0xff] }
 0x110   :  { %1883 = vmatprep.subr.mxu1 %v2264_v0 }
 0x111   :  { %1884 = vmatpush3.msra.mxu1 %v2375_v58 }
 0x112   :  { %1885 = vmatprep.subr.mxu1 %v2264_v0 }
 0x113   :  { %1886 = vmatpush3.msra.mxu1 %v2379_v59 }
 0x114   :  { %1887 = vmatprep.subr.mxu1 %v2264_v0 }
 0x115   :  { %1888 = vmatpush3.msra.mxu1 %v2383_v60 }
 0x116   :  { %1890 = vmatmul.mubr.msk.f32.vlgmr.msra.gmra.mxu1 %vm441_vm3, %v2266_v62  ;;  %1892 = vmatprep.subr.mxu1 %v2264_v0 }
 0x117   :  { %1893 = vmatpush3.msra.mxu1 %v2387_v61  ;;  %1924 = vmatprep.mubr.msk.f32.mxu1 %vm2265_vm2, %v2264_v0 }
 0x118   :  { %1894 = vmatprep.subr.mxu1 %v2264_v0 }
 0x119   :  { %1895 = vmatpush3.msra.mxu1 %v2393_v63 }
 0x11a   :  { %1896 = vmatprep.subr.mxu1 %v2264_v0 }
 0x11b   :  { %1897 = vmatpush3.msra.mxu1 %v2399_v1 }
 0x11c   :  { %1898 = vmatprep.subr.mxu1 %v2264_v0 }
 0x11d   :  { %1899 = vmatpush3.msra.mxu1 %v2403_v2 }
 0x11e   :  { %1900 = vmatprep.subr.mxu1 %v2264_v0 }
 0x11f   :  { %1901 = vmatpush3.msra.mxu1 %v2407_v3 }
 0x120   :  { %1902 = vmatprep.subr.mxu1 %v2264_v0 }
 0x121   :  { %1903 = vmatpush3.msra.mxu1 %v2411_v4 }
 0x122   :  { %1904 = vmatprep.subr.mxu1 %v2264_v0 }
 0x123   :  { %1905 = vmatpush3.msra.mxu1 %v2415_v5 }
 0x124   :  { %1906 = vmatprep.subr.mxu1 %v2264_v0 }
 0x125   :  { %1907 = vmatpush3.msra.mxu1 %v2419_v6 }
 0x126   :  { %1908 = vmatprep.subr.mxu1 %v2264_v0 }
 0x127   :  { %1909 = vmatpush3.msra.mxu1 %v2423_v7 }
 0x128   :  { %1910 = vmatprep.subr.mxu1 %v2264_v0 }
 0x129   :  { %1911 = vmatpush3.msra.mxu1 %v2427_v8 }
 0x12a   :  { %1912 = vmatprep.subr.mxu1 %v2264_v0 }
 0x12b   :  { %1913 = vmatpush3.msra.mxu1 %v2431_v9 }
 0x12c   :  { %1914 = vmatprep.subr.mxu1 %v2264_v0 }
 0x12d   :  { %1915 = vmatpush3.msra.mxu1 %v2435_v10 }
 0x12e   :  { %1916 = vmatprep.subr.mxu1 %v2264_v0 }
 0x12f   :  { %1917 = vmatpush3.msra.mxu1 %v2439_v11 }
 0x130   :  { %1918 = vmatprep.subr.mxu1 %v2264_v0 }
 0x131   :  { %1919 = vmatpush3.msra.mxu1 %v2443_v12 }
 0x132   :  { %1920 = vmatprep.subr.mxu1 %v2264_v0 }
 0x133   :  { %1921 = vmatpush3.msra.mxu1 %v2447_v13 }
 0x134   :  { %1922 = vmatprep.subr.mxu1 %v2264_v0 }
 0x135   :  { %1923 = vmatpush3.msra.mxu1 %v2453_v14 }
 0x136   :  { %1973 = vmatprep.subr.mxu1 %v1610_v34 }
 0x1d6   :  { %v511_v15 = vpop.f32.mrf.mxu1 }
 0x1d7   :  { %1925 = vmatmul.mubr.f32.vlgmr.msra.gmra.mxu1 %v511_v15  ;;  %v789_v15 = vld [vmem:[%s2825_s4 + $0x20] sm:$0xff] }
 0x1d8   :  { %v1891_v16 = vpop.f32.mrf.mxu1  ;;  %1974 = vmatpush3.msra.mxu1 %v1610_v34 }
 0x1d9   :  { %1975 = vmatprep.subr.mxu1 %v1609_v35  ;;  %v1626_v16 = vld [vmem:[%s2825_s4 + $0x178] sm:$0xff] }
 0x1da   :  { %1976 = vmatpush3.msra.mxu1 %v1609_v35 }
 0x1db   :  { %1977 = vmatprep.subr.mxu1 %v1608_v36 }
 0x1dc   :  { %1978 = vmatpush3.msra.mxu1 %v1608_v36 }
 0x1dd   :  { %1979 = vmatprep.subr.mxu1 %v1607_v37 }
 0x1de   :  { %1980 = vmatpush3.msra.mxu1 %v1607_v37 }
 0x1df   :  { %1981 = vmatprep.subr.mxu1 %v1606_v38 }
 0x1e0   :  { %1982 = vmatpush3.msra.mxu1 %v1606_v38  ;;  %v1594_v38 = vld [vmem:[%s2824_s3] ss:$0 sm:$0xff] }
 0x1e1   :  { %1983 = vmatprep.subr.mxu1 %v1605_v40 }
 0x1e2   :  { %1984 = vmatpush3.msra.mxu1 %v1605_v40 }
 0x1e3   :  { %1985 = vmatprep.subr.mxu1 %v1604_v42 }
 0x1e4   :  { %1986 = vmatpush3.msra.mxu1 %v1604_v42 }
 0x1e5   :  { %1987 = vmatprep.subr.mxu1 %v1603_v44 }
 0x1e6   :  { %1988 = vmatpush3.msra.mxu1 %v1603_v44 }
 0x1e7   :  { %1989 = vmatprep.subr.mxu1 %v1602_v46 }
 0x1e8   :  { %1990 = vmatpush3.msra.mxu1 %v1602_v46 }
 0x1e9   :  { %1991 = vmatprep.subr.mxu1 %v1601_v48 }
 0x1ea   :  { %1992 = vmatpush3.msra.mxu1 %v1601_v48 }
 0x1eb   :  { %1993 = vmatprep.subr.mxu1 %v1600_v50 }
 0x1ec   :  { %1994 = vmatpush3.msra.mxu1 %v1600_v50 }
 0x1ed   :  { %1995 = vmatprep.subr.mxu1 %v1599_v52 }
 0x1ee   :  { %1996 = vmatpush3.msra.mxu1 %v1599_v52  ;;  %v1622_v52 = vld [vmem:[%s2825_s4 + $0x158] sm:$0xff] }
 0x297   :  { %v581_v20 = vpop.f32.mrf.mxu1 }
 0x298   :  { %v585_v21 = vmul.f32 0.001953125, %v581_v20  ;;  %v787_v20 = vld [vmem:[%s2825_s4 + $0x10] sm:$0xff] }
 0x299   :  { %v1926_v22 = vpop.f32.mrf.mxu1 }
 0x29a   :  { %v589_v23 = vrot.slane %v585_v21, %v2459_v19  ;;  %v786_v21 = vld [vmem:[%s2825_s4 + $0x8] sm:$0xff]  ;;  %v785_v22 = vld [vmem:[%s2825_s4] sm:$0xff] }
 0x29c   :  { %v2463_v24 = vsub.f32 %v2373_v54, %v589_v23  ;;  %v2466_v25 = vsub.f32 %v2375_v58, %v589_v23  ;;  %v2471_v27 = vsub.f32 %v2379_v59, %v589_v23  ;;  %v2476_v29 = vsub.f32 %v2383_v60, %v589_v23  ;;  %v1598_v54 = vld [vmem:[%s2825_s4 + $0x98] sm:$0xff]  ;;  %v1596_v58 = vld [vmem:[%s2825_s4 + $0x88] sm:$0xff]  ;;  %v1595_v60 = vld [vmem:[%s2825_s4 + $0x80] sm:$0xff] }
 0x29d   :  { %1997 = vmatprep.subr.mxu1 %v1598_v54  ;;  %v790_v59 = vld [vmem:[%s2825_s4 + $0x28] sm:$0xff] }
 0x29e   :  { %v597_v26 = vmul.f32 %v2463_v24, %v2463_v24  ;;  %v596_v28 = vmul.f32 %v2466_v25, %v2466_v25  ;;  %v595_v30 = vmul.f32 %v2471_v27, %v2471_v27  ;;  %v594_v31 = vmul.f32 %v2476_v29, %v2476_v29  ;;  %1998 = vmatpush3.msra.mxu1 %v1598_v54 }
 0x29f   :  { %1999 = vmatprep.subr.mxu1 %v1597_v56 }
 0x2a0   :  { %1928 = vmatpush3.msra.mxu0 %v597_v26  ;;  %2000 = vmatpush3.msra.mxu1 %v1597_v56  ;;  %v1620_v56 = vld [vmem:[%s2825_s4 + $0x148] sm:$0xff] }
 0x2a1   :  { %1929 = vmatprep.subr.mxu0 %v2264_v0  ;;  %2001 = vmatprep.subr.mxu1 %v1596_v58 }
 0x2a2   :  { %1930 = vmatpush3.msra.mxu0 %v596_v28  ;;  %2002 = vmatpush3.msra.mxu1 %v1596_v58  ;;  %v1619_v58 = vld [vmem:[%s2825_s4 + $0x140] sm:$0xff] }
 0x2a3   :  { %1931 = vmatprep.subr.mxu0 %v2264_v0  ;;  %2003 = vmatprep.subr.mxu1 %v1595_v60 }
 0x2a4   :  { %1932 = vmatpush3.msra.mxu0 %v595_v30  ;;  %2004 = vmatpush3.msra.mxu1 %v1595_v60  ;;  %v1617_v60 = vld [vmem:[%s2825_s4 + $0x130] sm:$0xff] }
 0x2a5   :  { %1933 = vmatprep.subr.mxu0 %v2264_v0  ;;  %2049 = vmatprep.subr.mxu1 %v1626_v16 }
 0x2a6   :  { %1934 = vmatpush3.msra.mxu0 %v594_v31 }
 0x2a7   :  { %1936 = vmatmul.mubr.msk.f32.vlgmr.msra.gmra.mxu0 %vm441_vm3, %v2266_v62  ;;  %1938 = vmatprep.subr.mxu0 %v2264_v0 }
 0x2a8   :  { %1939 = vmatpush3.msra.mxu0 %v2387_v61  ;;  %1970 = vmatprep.mubr.msk.f32.mxu0 %vm2265_vm2, %v2264_v0 }
 0x2a9   :  { %1940 = vmatprep.subr.mxu0 %v2264_v0 }
 0x2aa   :  { %1941 = vmatpush3.msra.mxu0 %v2393_v63 }
 0x2ab   :  { %1942 = vmatprep.subr.mxu0 %v2264_v0 }
 0x2ac   :  { %1943 = vmatpush3.msra.mxu0 %v2399_v1 }
 0x2ad   :  { %1944 = vmatprep.subr.mxu0 %v2264_v0 }
 0x2ae   :  { %1945 = vmatpush3.msra.mxu0 %v2403_v2 }
 0x2af   :  { %1946 = vmatprep.subr.mxu0 %v2264_v0 }
 0x2b0   :  { %1947 = vmatpush3.msra.mxu0 %v2407_v3 }
 0x2b1   :  { %1948 = vmatprep.subr.mxu0 %v2264_v0 }
 0x2b2   :  { %1949 = vmatpush3.msra.mxu0 %v2411_v4 }
 0x2b3   :  { %1950 = vmatprep.subr.mxu0 %v2264_v0 }
 0x2b4   :  { %1951 = vmatpush3.msra.mxu0 %v2415_v5 }
 0x2b5   :  { %1952 = vmatprep.subr.mxu0 %v2264_v0 }
 0x2b6   :  { %1953 = vmatpush3.msra.mxu0 %v2419_v6 }
 0x2b7   :  { %1954 = vmatprep.subr.mxu0 %v2264_v0 }
 0x2b8   :  { %1955 = vmatpush3.msra.mxu0 %v2423_v7 }
 0x2b9   :  { %1956 = vmatprep.subr.mxu0 %v2264_v0 }
 0x2ba   :  { %1957 = vmatpush3.msra.mxu0 %v2427_v8 }
 0x2bb   :  { %1958 = vmatprep.subr.mxu0 %v2264_v0 }
 0x2bc   :  { %1959 = vmatpush3.msra.mxu0 %v2431_v9 }
 0x2bd   :  { %1960 = vmatprep.subr.mxu0 %v2264_v0 }
 0x2be   :  { %1961 = vmatpush3.msra.mxu0 %v2435_v10 }
 0x2bf   :  { %1962 = vmatprep.subr.mxu0 %v2264_v0 }
 0x2c0   :  { %1963 = vmatpush3.msra.mxu0 %v2439_v11 }
 0x2c1   :  { %1964 = vmatprep.subr.mxu0 %v2264_v0 }
 0x2c2   :  { %1965 = vmatpush3.msra.mxu0 %v2443_v12 }
 0x2c3   :  { %1966 = vmatprep.subr.mxu0 %v2264_v0 }
 0x2c4   :  { %1967 = vmatpush3.msra.mxu0 %v2447_v13 }
 0x2c5   :  { %1968 = vmatprep.subr.mxu0 %v2264_v0 }
 0x2c6   :  { %1969 = vmatpush3.msra.mxu0 %v2453_v14 }
 0x2c7   :  { %2011 = vmatprep.subr.mxu0 %v800_v39 }
 0x367   :  { %v664_v32 = vpop.f32.mrf.mxu0 }
 0x368   :  { %1971 = vmatmul.mubr.f32.vlgmr.msra.gmra.mxu0 %v664_v32 }
 0x369   :  { %v1937_v33 = vpop.f32.mrf.mxu0  ;;  %2012 = vmatpush3.msra.mxu0 %v800_v39 }
 0x36a   :  { %2013 = vmatprep.subr.mxu0 %v799_v41  ;;  %v1593_v33 = vld [vmem:[%s2823_s2] ss:$0 sm:$0xff] }
 0x36b   :  { %2014 = vmatpush3.msra.mxu0 %v799_v41 }
 0x36c   :  { %2015 = vmatprep.subr.mxu0 %v798_v43 }
 0x36d   :  { %2016 = vmatpush3.msra.mxu0 %v798_v43 }
 0x36e   :  { %2017 = vmatprep.subr.mxu0 %v797_v45 }
 0x36f   :  { %2018 = vmatpush3.msra.mxu0 %v797_v45 }
 0x370   :  { %2019 = vmatprep.subr.mxu0 %v796_v47 }
 0x371   :  { %2020 = vmatpush3.msra.mxu0 %v796_v47 }
 0x372   :  { %2021 = vmatprep.subr.mxu0 %v795_v49 }
 0x373   :  { %2022 = vmatpush3.msra.mxu0 %v795_v49  ;;  %v1623_v49 = vld [vmem:[%s2825_s4 + $0x160] sm:$0xff] }
 0x374   :  { %2023 = vmatprep.subr.mxu0 %v794_v51 }
 0x375   :  { %2024 = vmatpush3.msra.mxu0 %v794_v51 }
 0x376   :  { %2025 = vmatprep.subr.mxu0 %v793_v53 }
 0x377   :  { %2026 = vmatpush3.msra.mxu0 %v793_v53 }
 0x378   :  { %2027 = vmatprep.subr.mxu0 %v792_v55 }
 0x379   :  { %2028 = vmatpush3.msra.mxu0 %v792_v55  ;;  %v1621_v55 = vld [vmem:[%s2825_s4 + $0x150] sm:$0xff] }
 0x37a   :  { %2029 = vmatprep.subr.mxu0 %v791_v57 }
 0x37b   :  { %2030 = vmatpush3.msra.mxu0 %v791_v57 }
 0x37c   :  { %2031 = vmatprep.subr.mxu0 %v790_v59 }
 0x37d   :  { %2032 = vmatpush3.msra.mxu0 %v790_v59  ;;  %v1618_v59 = vld [vmem:[%s2825_s4 + $0x138] sm:$0xff] }
 0x37e   :  { %2033 = vmatprep.subr.mxu0 %v789_v15 }
 0x37f   :  { %2034 = vmatpush3.msra.mxu0 %v789_v15  ;;  %v1616_v15 = vld [vmem:[%s2825_s4 + $0x128] sm:$0xff] }
 0x380   :  { %2035 = vmatprep.subr.mxu0 %v788_v17 }
 0x381   :  { %2036 = vmatpush3.msra.mxu0 %v788_v17  ;;  %v1614_v17 = vld [vmem:[%s2825_s4 + $0x118] sm:$0xff] }
 0x382   :  { %2037 = vmatprep.subr.mxu0 %v787_v20 }
 0x383   :  { %2038 = vmatpush3.msra.mxu0 %v787_v20  ;;  %v1613_v20 = vld [vmem:[%s2825_s4 + $0x110] sm:$0xff] }
 0x384   :  { %2039 = vmatprep.subr.mxu0 %v786_v21 }
 0x385   :  { %2040 = vmatpush3.msra.mxu0 %v786_v21  ;;  %v1612_v21 = vld [vmem:[%s2825_s4 + $0x108] sm:$0xff] }
 0x386   :  { %2041 = vmatprep.subr.mxu0 %v785_v22 }
 0x387   :  { %2042 = vmatpush3.msra.mxu0 %v785_v22  ;;  %v1611_v22 = vld [vmem:[%s2825_s4 + $0x100] sm:$0xff] }
 0x388   :  { %2087 = vmatprep.subr.mxu0 %v2264_v0 }
 0x428   :  { %v734_v23 = vpop.f32.mrf.mxu0 }
 0x429   :  { %v738_v26 = vmul.f32 0.001953125, %v734_v23 }
 0x42a   :  { %v1972_v28 = vpop.f32.mrf.mxu0 }
 0x42b   :  { %v739_v30 = vadd.f32 1e-05, %v738_v26 }
 0x42d   :  { %2189 = vrsqrt.f32 %v739_v30 }
 0x43a   :  { %v2190_v31 = vpop.eup %2189 }
 0x43b   :  { %v744_v32 = vrot.slane %v2190_v31, %v2459_v19 }
 0x43d   :  { %v745_v34 = vmul.f32 %v744_v32, %v2476_v29  ;;  %v746_v35 = vmul.f32 %v744_v32, %v2471_v27  ;;  %v747_v36 = vmul.f32 %v744_v32, %v2466_v25  ;;  %v748_v37 = vmul.f32 %v744_v32, %v2463_v24  ;;  %v1625_v24 = vld [vmem:[%s2825_s4 + $0x170] sm:$0xff]  ;;  %v1624_v25 = vld [vmem:[%s2825_s4 + $0x168] sm:$0xff] }
 0x43f   :  { %v755_v39 = vmul.f32 %v1593_v33, %v745_v34  ;;  %v756_v40 = vmul.f32 %v1593_v33, %v746_v35  ;;  %v757_v41 = vmul.f32 %v1593_v33, %v747_v36  ;;  %v758_v42 = vmul.f32 %v1593_v33, %v748_v37 }
 0x441   :  { %v765_v43 = vadd.f32 %v1594_v38, %v755_v39  ;;  %v766_v44 = vadd.f32 %v1594_v38, %v756_v40  ;;  %v767_v45 = vadd.f32 %v1594_v38, %v757_v41  ;;  %v768_v46 = vadd.f32 %v1594_v38, %v758_v42 }
 0x443   :  { %v769_v47 = vmax.f32 %v765_v43, 0.0  ;;  %v770_v29 = vmax.f32 %v766_v44, 0.0  ;;  %v771_v48 = vmax.f32 %v767_v45, 0.0  ;;  %v772_v27 = vmax.f32 %v768_v46, 0.0 }
 0x445   :  { %777 = vst [vmem:[#allocation3 + $0x1] sm:$0xff] %v769_v47  ;;  %778 = vst [vmem:[#allocation3 + $0x9] sm:$0xff] %v770_v29  ;;  %2005 = vmatprep.mubr.f32.mxu1 %v769_v47 }
 0x446   :  { %779 = vst [vmem:[#allocation3 + $0x19] sm:$0xff] %v771_v48  ;;  %780 = vst [vmem:[#allocation3 + $0x21] sm:$0xff] %v772_v27  ;;  %2006 = vmatmul.mubr.f32.vlgmr.msra.gmra.mxu1 %v770_v29 }
 0x447   :  { %2050 = vmatpush3.msra.mxu1 %v1626_v16  ;;  %2008 = vmatprep.mubr.f32.mxu1 %v771_v48  ;;  %v1615_v16 = vld [vmem:[%s2825_s4 + $0x120] sm:$0xff] }
 0x448   :  { %2051 = vmatprep.subr.mxu1 %v1625_v24 }
 0x449   :  { %2052 = vmatpush3.msra.mxu1 %v1625_v24 }
 0x44a   :  { %2053 = vmatprep.subr.mxu1 %v1624_v25  ;;  %2009 = vmatmul.mubr.f32.gmra.mxu1 %v772_v27 }
 0x44b   :  { %2054 = vmatpush3.msra.mxu1 %v1624_v25 }
 0x44c   :  { %v781_v50 = vld [vmem:[#allocation3] sm:$0xff]  ;;  %v782_v51 = vld [vmem:[#allocation3 + $0x8] sm:$0xff]  ;;  %2055 = vmatprep.subr.mxu1 %v1623_v49 }
 0x44d   :  { %2043 = vmatprep.mubr.f32.mxu0 %v781_v50  ;;  %v992_v53 = vld [vmem:[#allocation3 + $0x2] sm:$0xff]  ;;  %2056 = vmatpush3.msra.mxu1 %v1623_v49  ;;  %v783_v54 = vld [vmem:[#allocation3 + $0x18] sm:$0xff]  ;;  %v993_v23 = vld [vmem:[#allocation3 + $0xa] sm:$0xff] }
 0x44e   :  { %2044 = vmatmul.mubr.f32.vlgmr.msra.gmra.mxu0 %v782_v51  ;;  %2081 = vmatprep.mubr.f32.mxu1 %v992_v53  ;;  %v784_v57 = vld [vmem:[#allocation3 + $0x20] sm:$0xff] }
 0x44f   :  { %2046 = vmatprep.mubr.f32.mxu0 %v783_v54  ;;  %2057 = vmatprep.subr.mxu1 %v1622_v52  ;;  %v994_v26 = vld [vmem:[#allocation3 + $0x1a] sm:$0xff]  ;;  %v995_v28 = vld [vmem:[#allocation3 + $0x22] sm:$0xff] }
 0x450   :  { %2058 = vmatpush3.msra.mxu1 %v1622_v52 }
 0x451   :  { %2059 = vmatprep.subr.mxu1 %v1621_v55 }
 0x452   :  { %2047 = vmatmul.mubr.f32.gmra.mxu0 %v784_v57  ;;  %2060 = vmatpush3.msra.mxu1 %v1621_v55 }
 0x453   :  { %2061 = vmatprep.subr.mxu1 %v1620_v56  ;;  %2095 = vmatprep.mubr.msk.f32.mxu0 %vm2265_vm2, %v2264_v0 }
 0x454   :  { %2062 = vmatpush3.msra.mxu1 %v1620_v56 }
 0x455   :  { %2063 = vmatprep.subr.mxu1 %v1619_v58 }
 0x456   :  { %2064 = vmatpush3.msra.mxu1 %v1619_v58 }
 0x457   :  { %2065 = vmatprep.subr.mxu1 %v1618_v59 }
 0x458   :  { %2066 = vmatpush3.msra.mxu1 %v1618_v59 }
 0x459   :  { %2067 = vmatprep.subr.mxu1 %v1617_v60 }
 0x45a   :  { %2068 = vmatpush3.msra.mxu1 %v1617_v60  ;;  %v1448_v60 = vld [vmem:[#allocation8 + $0x80] sm:$0xff] }
 0x45b   :  { %2069 = vmatprep.subr.mxu1 %v1616_v15 }
 0x45c   :  { %2070 = vmatpush3.msra.mxu1 %v1616_v15  ;;  %v1447_v15 = vld [vmem:[#allocation8 + $0x78] sm:$0xff] }
 0x45d   :  { %2071 = vmatprep.subr.mxu1 %v1615_v16 }
 0x45e   :  { %2072 = vmatpush3.msra.mxu1 %v1615_v16  ;;  %v1446_v16 = vld [vmem:[#allocation8 + $0x70] sm:$0xff] }
 0x45f   :  { %2073 = vmatprep.subr.mxu1 %v1614_v17 }
 0x460   :  { %2074 = vmatpush3.msra.mxu1 %v1614_v17  ;;  %v1445_v17 = vld [vmem:[#allocation8 + $0x68] sm:$0xff] }
 0x461   :  { %2075 = vmatprep.subr.mxu1 %v1613_v20 }
 0x462   :  { %2076 = vmatpush3.msra.mxu1 %v1613_v20  ;;  %v1444_v20 = vld [vmem:[#allocation8 + $0x60] sm:$0xff] }
 0x463   :  { %2077 = vmatprep.subr.mxu1 %v1612_v21 }
 0x464   :  { %2078 = vmatpush3.msra.mxu1 %v1612_v21  ;;  %v1443_v21 = vld [vmem:[#allocation8 + $0x58] sm:$0xff] }
 0x465   :  { %2079 = vmatprep.subr.mxu1 %v1611_v22 }
 0x466   :  { %2080 = vmatpush3.msra.mxu1 %v1611_v22  ;;  %v1442_v22 = vld [vmem:[#allocation8 + $0x50] sm:$0xff] }
 0x467   :  { %2082 = vmatmul.mubr.f32.vlgmr.msra.gmra.mxu1 %v993_v23  ;;  %2133 = vmatprep.subr.mxu1 %v2264_v0  ;;  %v1441_v23 = vld [vmem:[#allocation8 + $0x48] sm:$0xff] }
 0x468   :  { %2084 = vmatprep.mubr.f32.mxu1 %v994_v26  ;;  %v1440_v26 = vld [vmem:[#allocation8 + $0x40] sm:$0xff] }
 0x46b   :  { %2085 = vmatmul.mubr.f32.gmra.mxu1 %v995_v28  ;;  %v1439_v28 = vld [vmem:[#allocation8 + $0x38] sm:$0xff] }
 0x46c   :  { %2141 = vmatprep.mubr.msk.f32.mxu1 %vm2265_vm2, %v2264_v0 }
 0x506   :  { %v2007_v30 = vpop.f32.mrf.mxu1 }
 0x508   :  { %v888_v32 = vpop.f32.mrf.mxu1 }
 0x50a   :  { %v2010_v34 = vpop.f32.mrf.mxu1 }
 0x50c   :  { %v898_v36 = vpop.f32.mrf.mxu1 }
 0x50e   :  { %v2045_v31 = vpop.f32.mrf.mxu0 }
 0x50f   :  { %v979_v45 = vadd.f32 %v2045_v31, %v2007_v30  ;;  %v1438_v30 = vld [vmem:[#allocation8 + $0x30] sm:$0xff]  ;;  %v1437_v31 = vld [vmem:[#allocation8 + $0x28] sm:$0xff] }
 0x510   :  { %v973_v33 = vpop.f32.mrf.mxu0 }
 0x511   :  { %v974_v47 = vadd.f32 %v973_v33, %v888_v32  ;;  %v1436_v32 = vld [vmem:[#allocation8 + $0x20] sm:$0xff]  ;;  %v1435_v33 = vld [vmem:[#allocation8 + $0x18] sm:$0xff] }
 0x512   :  { %v2048_v35 = vpop.f32.mrf.mxu0 }
 0x513   :  { %v989_v40 = vadd.f32 %v2048_v35, %v2010_v34  ;;  %v1434_v34 = vld [vmem:[#allocation8 + $0x10] sm:$0xff]  ;;  %v1433_v35 = vld [vmem:[#allocation8 + $0x8] sm:$0xff] }
 0x514   :  { %v983_v38 = vpop.f32.mrf.mxu0 }
 0x515   :  { %v984_v42 = vadd.f32 %v983_v38, %v898_v36  ;;  %v1432_v36 = vld [vmem:[#allocation8] sm:$0xff] }
 0x527   :  { %v2083_v37 = vpop.f32.mrf.mxu1 }
 0x528   :  { %v1099_v29 = vadd.f32 %v2083_v37, %v979_v45 }
 0x529   :  { %v1079_v39 = vpop.f32.mrf.mxu1 }
 0x52a   :  { %v1098_v48 = vadd.f32 %v1079_v39, %v974_v47 }
 0x52b   :  { %v2086_v41 = vpop.f32.mrf.mxu1 }
 0x52c   :  { %v1101_v43 = vadd.f32 %v2086_v41, %v989_v40 }
 0x52d   :  { %v1089_v44 = vpop.f32.mrf.mxu1 }
 0x52e   :  { %v1100_v46 = vadd.f32 %v1089_v44, %v984_v42  ;;  %2088 = vmatpush3.msra.mxu0 %v1101_v43 }
 0x52f   :  { %2089 = vmatprep.subr.mxu0 %v2264_v0 }
 0x530   :  { %2090 = vmatpush3.msra.mxu0 %v1100_v46 }
 0x531   :  { %2091 = vmatprep.subr.mxu0 %v2264_v0 }
 0x532   :  { %2092 = vmatpush3.msra.mxu0 %v1099_v29 }
 0x533   :  { %2093 = vmatprep.subr.mxu0 %v2264_v0 }
 0x534   :  { %2094 = vmatpush3.msra.mxu0 %v1098_v48 }
 0x535   :  { %2096 = vmatmul.mubr.msk.f32.vlgmr.msra.gmra.mxu0 %vm441_vm3, %v2266_v62  ;;  %2098 = vmatprep.subr.mxu0 %v2264_v0 }
 0x536   :  { %2099 = vmatpush3.msra.mxu0 %v2387_v61  ;;  %2130 = vmatprep.mubr.msk.f32.mxu0 %vm2265_vm2, %v2264_v0 }
 0x537   :  { %2100 = vmatprep.subr.mxu0 %v2264_v0 }
 0x538   :  { %2101 = vmatpush3.msra.mxu0 %v2393_v63 }
 0x539   :  { %2102 = vmatprep.subr.mxu0 %v2264_v0 }
 0x53a   :  { %2103 = vmatpush3.msra.mxu0 %v2399_v1 }
 0x53b   :  { %2104 = vmatprep.subr.mxu0 %v2264_v0 }
 0x53c   :  { %2105 = vmatpush3.msra.mxu0 %v2403_v2 }
 0x53d   :  { %2106 = vmatprep.subr.mxu0 %v2264_v0 }
 0x53e   :  { %2107 = vmatpush3.msra.mxu0 %v2407_v3 }
 0x53f   :  { %2108 = vmatprep.subr.mxu0 %v2264_v0 }
 0x540   :  { %2109 = vmatpush3.msra.mxu0 %v2411_v4 }
 0x541   :  { %2110 = vmatprep.subr.mxu0 %v2264_v0 }
 0x542   :  { %2111 = vmatpush3.msra.mxu0 %v2415_v5 }
 0x543   :  { %2112 = vmatprep.subr.mxu0 %v2264_v0 }
 0x544   :  { %2113 = vmatpush3.msra.mxu0 %v2419_v6 }
 0x545   :  { %2114 = vmatprep.subr.mxu0 %v2264_v0 }
 0x546   :  { %2115 = vmatpush3.msra.mxu0 %v2423_v7 }
 0x547   :  { %2116 = vmatprep.subr.mxu0 %v2264_v0 }
 0x548   :  { %2117 = vmatpush3.msra.mxu0 %v2427_v8 }
 0x549   :  { %2118 = vmatprep.subr.mxu0 %v2264_v0 }
 0x54a   :  { %2119 = vmatpush3.msra.mxu0 %v2431_v9 }
 0x54b   :  { %2120 = vmatprep.subr.mxu0 %v2264_v0 }
 0x54c   :  { %2121 = vmatpush3.msra.mxu0 %v2435_v10 }
 0x54d   :  { %2122 = vmatprep.subr.mxu0 %v2264_v0 }
 0x54e   :  { %2123 = vmatpush3.msra.mxu0 %v2439_v11 }
 0x54f   :  { %2124 = vmatprep.subr.mxu0 %v2264_v0 }
 0x550   :  { %2125 = vmatpush3.msra.mxu0 %v2443_v12 }
 0x551   :  { %2126 = vmatprep.subr.mxu0 %v2264_v0 }
 0x552   :  { %2127 = vmatpush3.msra.mxu0 %v2447_v13 }
 0x553   :  { %2128 = vmatprep.subr.mxu0 %v2264_v0 }
 0x554   :  { %2129 = vmatpush3.msra.mxu0 %v2453_v14 }
 0x5f5   :  { %v1170_v27 = vpop.f32.mrf.mxu0 }
 0x5f6   :  { %2131 = vmatmul.mubr.f32.vlgmr.msra.gmra.mxu0 %v1170_v27 }
 0x5f7   :  { %v2097_v24 = vpop.f32.mrf.mxu0  ;;  %1540 = vmatprep.mubr.f32.mxu0 %v2264_v0 }
 0x6b6   :  { %v1240_v25 = vpop.f32.mrf.mxu0 }
 0x6b7   :  { %v1244_v49 = vmul.f32 0.001953125, %v1240_v25 }
 0x6b8   :  { %v2132_v50 = vpop.f32.mrf.mxu0 }
 0x6b9   :  { %v1248_v51 = vrot.slane %v1244_v49, %v2459_v19 }
 0x6bb   :  { %v2723_v52 = vsub.f32 %v1101_v43, %v1248_v51  ;;  %v2725_v53 = vsub.f32 %v1100_v46, %v1248_v51  ;;  %v2729_v55 = vsub.f32 %v1099_v29, %v1248_v51  ;;  %v2733_v57 = vsub.f32 %v1098_v48, %v1248_v51  ;;  %v1629_v43 = vld [vmem:[%s2826_s5] ss:$0 sm:$0xff] }
 0x6bc   :  { %v1630_v46 = vld [vmem:[%s2827_s6] ss:$0 sm:$0xff] }
 0x6bd   :  { %v1256_v54 = vmul.f32 %v2723_v52, %v2723_v52  ;;  %v1255_v56 = vmul.f32 %v2725_v53, %v2725_v53  ;;  %v1254_v58 = vmul.f32 %v2729_v55, %v2729_v55  ;;  %v1253_v59 = vmul.f32 %v2733_v57, %v2733_v57 }
 0x6bf   :  { %2134 = vmatpush3.msra.mxu1 %v1256_v54 }
 0x6c0   :  { %2135 = vmatprep.subr.mxu1 %v2264_v0 }
 0x6c1   :  { %2136 = vmatpush3.msra.mxu1 %v1255_v56 }
 0x6c2   :  { %2137 = vmatprep.subr.mxu1 %v2264_v0 }
 0x6c3   :  { %2138 = vmatpush3.msra.mxu1 %v1254_v58  ;;  %v1472_v58 = vsub.s32 1, %v2456_v18 }
 0x6c4   :  { %2139 = vmatprep.subr.mxu1 %v2264_v0 }
 0x6c5   :  { %2140 = vmatpush3.msra.mxu1 %v1253_v59 }
 0x6c6   :  { %2142 = vmatmul.mubr.msk.f32.vlgmr.msra.gmra.mxu1 %vm441_vm3, %v2266_v62  ;;  %2144 = vmatprep.subr.mxu1 %v2264_v0  ;;  %v1462_v62 = vld [vmem:[#allocation8 + $0xf0] sm:$0xff] }
 0x6c7   :  { %2145 = vmatpush3.msra.mxu1 %v2387_v61  ;;  %2176 = vmatprep.mubr.msk.f32.mxu1 %vm2265_vm2, %v2264_v0  ;;  %v1463_v61 = vld [vmem:[#allocation8 + $0xf8] sm:$0xff] }
 0x6c8   :  { %2146 = vmatprep.subr.mxu1 %v2264_v0  ;;  %1476 = vmatprep.subr.mxu0 %v1463_v61 }
 0x6c9   :  { %2147 = vmatpush3.msra.mxu1 %v2393_v63  ;;  %v1461_v63 = vld [vmem:[#allocation8 + $0xe8] sm:$0xff]  ;;  %1477 = vmatpush1.msra.mxu0 %v1462_v62 }
 0x6ca   :  { %2148 = vmatprep.subr.mxu1 %v2264_v0  ;;  %1478 = vmatprep.subr.mxu0 %v1461_v63 }
 0x6cb   :  { %2149 = vmatpush3.msra.mxu1 %v2399_v1 }
 0x6cc   :  { %2150 = vmatprep.subr.mxu1 %v2264_v0 }
 0x6cd   :  { %2151 = vmatpush3.msra.mxu1 %v2403_v2 }
 0x6ce   :  { %2152 = vmatprep.subr.mxu1 %v2264_v0 }
 0x6cf   :  { %2153 = vmatpush3.msra.mxu1 %v2407_v3  ;;  %v1460_v3 = vld [vmem:[#allocation8 + $0xe0] sm:$0xff] }
 0x6d0   :  { %2154 = vmatprep.subr.mxu1 %v2264_v0  ;;  %1479 = vmatpush1.msra.mxu0 %v1460_v3 }
 0x6d1   :  { %2155 = vmatpush3.msra.mxu1 %v2411_v4  ;;  %v1459_v4 = vld [vmem:[#allocation8 + $0xd8] sm:$0xff] }
 0x6d2   :  { %2156 = vmatprep.subr.mxu1 %v2264_v0  ;;  %1480 = vmatprep.subr.mxu0 %v1459_v4 }
 0x6d3   :  { %2157 = vmatpush3.msra.mxu1 %v2415_v5  ;;  %v1458_v5 = vld [vmem:[#allocation8 + $0xd0] sm:$0xff] }
 0x6d4   :  { %2158 = vmatprep.subr.mxu1 %v2264_v0  ;;  %1481 = vmatpush1.msra.mxu0 %v1458_v5 }
 0x6d5   :  { %2159 = vmatpush3.msra.mxu1 %v2419_v6  ;;  %v1457_v6 = vld [vmem:[#allocation8 + $0xc8] sm:$0xff] }
 0x6d6   :  { %2160 = vmatprep.subr.mxu1 %v2264_v0  ;;  %1482 = vmatprep.subr.mxu0 %v1457_v6 }
 0x6d7   :  { %2161 = vmatpush3.msra.mxu1 %v2423_v7  ;;  %v1456_v7 = vld [vmem:[#allocation8 + $0xc0] sm:$0xff] }
 0x6d8   :  { %2162 = vmatprep.subr.mxu1 %v2264_v0  ;;  %1483 = vmatpush1.msra.mxu0 %v1456_v7 }
 0x6d9   :  { %2163 = vmatpush3.msra.mxu1 %v2427_v8  ;;  %v1455_v8 = vld [vmem:[#allocation8 + $0xb8] sm:$0xff] }
 0x6da   :  { %2164 = vmatprep.subr.mxu1 %v2264_v0  ;;  %1484 = vmatprep.subr.mxu0 %v1455_v8 }
 0x6db   :  { %2165 = vmatpush3.msra.mxu1 %v2431_v9  ;;  %v1454_v9 = vld [vmem:[#allocation8 + $0xb0] sm:$0xff] }
 0x6dc   :  { %2166 = vmatprep.subr.mxu1 %v2264_v0  ;;  %1485 = vmatpush1.msra.mxu0 %v1454_v9 }
 0x6dd   :  { %2167 = vmatpush3.msra.mxu1 %v2435_v10  ;;  %v1453_v10 = vld [vmem:[#allocation8 + $0xa8] sm:$0xff] }
 0x6de   :  { %2168 = vmatprep.subr.mxu1 %v2264_v0  ;;  %1486 = vmatprep.subr.mxu0 %v1453_v10 }
 0x6df   :  { %2169 = vmatpush3.msra.mxu1 %v2439_v11  ;;  %v1452_v11 = vld [vmem:[#allocation8 + $0xa0] sm:$0xff] }
 0x6e0   :  { %2170 = vmatprep.subr.mxu1 %v2264_v0  ;;  %1487 = vmatpush1.msra.mxu0 %v1452_v11 }
 0x6e1   :  { %2171 = vmatpush3.msra.mxu1 %v2443_v12  ;;  %v1451_v12 = vld [vmem:[#allocation8 + $0x98] sm:$0xff] }
 0x6e2   :  { %2172 = vmatprep.subr.mxu1 %v2264_v0  ;;  %1488 = vmatprep.subr.mxu0 %v1451_v12 }
 0x6e3   :  { %2173 = vmatpush3.msra.mxu1 %v2447_v13  ;;  %v1450_v13 = vld [vmem:[#allocation8 + $0x90] sm:$0xff] }
 0x6e4   :  { %2174 = vmatprep.subr.mxu1 %v2264_v0  ;;  %1489 = vmatpush1.msra.mxu0 %v1450_v13 }
 0x6e5   :  { %2175 = vmatpush3.msra.mxu1 %v2453_v14  ;;  %v1449_v14 = vld [vmem:[#allocation8 + $0x88] sm:$0xff] }
 0x6e6   :  { %1490 = vmatprep.subr.mxu0 %v1449_v14 }
 0x6e7   :  { %1491 = vmatpush1.msra.mxu0 %v1448_v60 }
 0x6e8   :  { %1492 = vmatprep.subr.mxu0 %v1447_v15 }
 0x6e9   :  { %1493 = vmatpush1.msra.mxu0 %v1446_v16 }
 0x6ea   :  { %1494 = vmatprep.subr.mxu0 %v1445_v17 }
 0x6eb   :  { %1495 = vmatpush1.msra.mxu0 %v1444_v20 }
 0x6ec   :  { %1496 = vmatprep.subr.mxu0 %v1443_v21 }
 0x6ed   :  { %1497 = vmatpush1.msra.mxu0 %v1442_v22 }
 0x6ee   :  { %1498 = vmatprep.subr.mxu0 %v1441_v23 }
 0x6ef   :  { %1499 = vmatpush1.msra.mxu0 %v1440_v26 }
 0x6f0   :  { %1500 = vmatprep.subr.mxu0 %v1439_v28 }
 0x6f1   :  { %1501 = vmatpush1.msra.mxu0 %v1438_v30 }
 0x6f2   :  { %1502 = vmatprep.subr.mxu0 %v1437_v31 }
 0x6f3   :  { %1503 = vmatpush1.msra.mxu0 %v1436_v32 }
 0x6f4   :  { %1504 = vmatprep.subr.mxu0 %v1435_v33 }
 0x6f5   :  { %1505 = vmatpush1.msra.mxu0 %v1434_v34 }
 0x6f6   :  { %1506 = vmatprep.subr.mxu0 %v1433_v35 }
 0x6f7   :  { %1507 = vmatpush1.msra.mxu0 %v1432_v36 }
 0x786   :  { %v1323_v1 = vpop.f32.mrf.mxu1 }
 0x787   :  { %2177 = vmatmul.mubr.f32.vlgmr.msra.gmra.mxu1 %v1323_v1 }
 0x788   :  { %v2143_v2 = vpop.f32.mrf.mxu1 }
 0x847   :  { %v1393_v37 = vpop.f32.mrf.mxu1 }
 0x848   :  { %v1397_v38 = vmul.f32 0.001953125, %v1393_v37 }
 0x849   :  { %v2178_v39 = vpop.f32.mrf.mxu1 }
 0x84a   :  { %v1398_v40 = vadd.f32 1e-05, %v1397_v38 }
 0x84c   :  { %2191 = vrsqrt.f32 %v1398_v40 }
 0x859   :  { %v2192_v41 = vpop.eup %2191 }
 0x85a   :  { %v1403_v42 = vrot.slane %v2192_v41, %v2459_v19 }
 0x85c   :  { %v1404_v44 = vmul.f32 %v1403_v42, %v2733_v57  ;;  %v1405_v45 = vmul.f32 %v1403_v42, %v2729_v55  ;;  %v1406_v48 = vmul.f32 %v1403_v42, %v2725_v53  ;;  %v1407_v50 = vmul.f32 %v1403_v42, %v2723_v52  ;;  %v1464_v52 = vld [vmem:[%s2830_s9] sm:$0x3] }
 0x85d   :  { %v1469_v59 = vrot.slane %v1464_v52, %v2459_v19  ;;  %v1473_v61 = vrot.slane %v1464_v52, %v1472_v58 }
 0x85e   :  { %v1414_v47 = vmul.f32 %v1629_v43, %v1404_v44  ;;  %v1415_v29 = vmul.f32 %v1629_v43, %v1405_v45  ;;  %v1416_v49 = vmul.f32 %v1629_v43, %v1406_v48  ;;  %v1417_v55 = vmul.f32 %v1629_v43, %v1407_v50 }
 0x860   :  { %v1424_v27 = vadd.f32 %v1630_v46, %v1414_v47  ;;  %v1425_v25 = vadd.f32 %v1630_v46, %v1415_v29  ;;  %v1426_v54 = vadd.f32 %v1630_v46, %v1416_v49  ;;  %v1427_v57 = vadd.f32 %v1630_v46, %v1417_v55 }
 0x862   :  { %v1428_v24 = vmax.f32 %v1424_v27, 0.0  ;;  %v1429_v51 = vmax.f32 %v1425_v25, 0.0  ;;  %v1430_v56 = vmax.f32 %v1426_v54, 0.0  ;;  %v1431_v53 = vmax.f32 %v1427_v57, 0.0 }
 0x864   :  { %1541 = vmatmul.mubr.f32.vlgmr.msra.gmra.mxu0 %v1428_v24 }
 0x865   :  { %1546 = vmatprep.mubr.f32.mxu0 %v2264_v0 }
 0x868   :  { %1547 = vmatmul.mubr.f32.gmra.mxu0 %v1429_v51 }
 0x869   :  { %1552 = vmatprep.mubr.f32.mxu0 %v2264_v0 }
 0x86c   :  { %1553 = vmatmul.mubr.f32.gmra.mxu0 %v1430_v56 }
 0x86d   :  { %1558 = vmatprep.mubr.f32.mxu0 %v2264_v0 }
 0x870   :  { %1559 = vmatmul.mubr.f32.gmra.mxu0 %v1431_v53 }
 0x924   :  { %v1542_v62 = vpop.f32.mrf.mxu0 }
 0x925   :  { %v1543_v63 = vadd.f32 %v1542_v62, %v1469_v59 }
 0x926   :  { %v1544_v1 = vpop.f32.mrf.mxu0 }
 0x927   :  { %1565 = vst [vmem:[%s2831_s10] sm:$0xff] %v1543_v63  ;;  %v1545_v2 = vadd.f32 %v1544_v1, %v1473_v61 }
 0x928   :  { %v1548_v0 = vpop.f32.mrf.mxu0 }
 0x929   :  { %1566 = vst [vmem:[%s2831_s10 + $0x8] sm:$0xff] %v1545_v2  ;;  %v1549_v3 = vadd.f32 %v1548_v0, %v1469_v59 }
 0x92a   :  { %v1550_v4 = vpop.f32.mrf.mxu0 }
 0x92b   :  { %1567 = vst [vmem:[%s2831_s10 + $0x10] sm:$0xff] %v1549_v3  ;;  %v1551_v18 = vadd.f32 %v1550_v4, %v1473_v61 }
 0x92c   :  { %v1554_v19 = vpop.f32.mrf.mxu0 }
 0x92d   :  { %1568 = vst [vmem:[%s2831_s10 + $0x18] sm:$0xff] %v1551_v18  ;;  %v1555_v5 = vadd.f32 %v1554_v19, %v1469_v59 }
 0x92e   :  { %v1556_v6 = vpop.f32.mrf.mxu0 }
 0x92f   :  { %1569 = vst [vmem:[%s2831_s10 + $0x20] sm:$0xff] %v1555_v5  ;;  %v1557_v7 = vadd.f32 %v1556_v6, %v1473_v61 }
 0x930   :  { %v1560_v8 = vpop.f32.mrf.mxu0 }
 0x931   :  { %1570 = vst [vmem:[%s2831_s10 + $0x28] sm:$0xff] %v1557_v7  ;;  %v1561_v9 = vadd.f32 %v1560_v8, %v1469_v59 }
 0x932   :  { %v1562_v10 = vpop.f32.mrf.mxu0 }
 0x933   :  { %1571 = vst [vmem:[%s2831_s10 + $0x30] sm:$0xff] %v1561_v9  ;;  %v1563_v11 = vadd.f32 %v1562_v10, %v1473_v61 }
 0x935   :  { %1572 = vst [vmem:[%s2831_s10 + $0x38] sm:$0xff] %v1563_v11 }
 0x936   :  { %1577 = vsyncpa [#allocation5], 1 }
 0x937   :  { %1578 = vsyncpa [#allocation7], 1 }

</bundles_post_ra>
